<compile_context>
chip_gen: v6e
topology: v6e:2x2x1
jax: 0.10.0
libtpu: 0.0.40
codegen_flags: <defaults>
</compile_context>

<pallas_src>
import functools

import jax
import jax.numpy as jnp
from jax import lax
from jax.experimental import pallas as pl
from jax.experimental.pallas import tpu as pltpu

# TODO(synk): exact srl-zoo constants MAX_X/MIN_X/MAX_Y/MIN_Y and the precise
# gaussian_target() sigma are not available; a unit-bound Gaussian heatmap is used.
MAX_X, MIN_X, MAX_Y, MIN_Y = 1.0, -1.0, 1.0, -1.0
BN_EPS = 1e-5
OC_PAD = 128          # conv outputs carry 64 real + 64 zero channels -> lane-dense stores


def conv_out(n, k, s, p):
    return (n + 2 * p - k) // s + 1


def round_up(n, m):
    return (n + m - 1) // m * m


# ---------------------------------------------------------------------------
# Pallas kernel: (chunk, K) x (K, 128) GEMM + folded-BN shift + ReLU.
# One MXU dot per grid step; all conv taps are already folded into K.
# ---------------------------------------------------------------------------
def _gemm_bias_relu_kernel(x_ref, w_ref, b_ref, o_ref):
    acc = jnp.dot(x_ref[...], w_ref[...], preferred_element_type=jnp.float32)
    o_ref[...] = jnp.maximum(acc + b_ref[...], 0.0).astype(o_ref.dtype)


def gemm_bias_relu(patches, w, shift, *, chunk=256):
    """patches: (M, K) bf16, w: (K, N) bf16, shift: (1, N) f32 -> (M, N) bf16."""
    M, K = patches.shape
    Kw, N = w.shape
    assert K == Kw and shift.shape == (1, N), (patches.shape, w.shape, shift.shape)
    chunk = min(chunk, round_up(M, 8))          # small layers: one grid step
    Mp = round_up(M, chunk)
    if Mp != M:
        patches = jnp.pad(patches, ((0, Mp - M), (0, 0)))
    out = pl.pallas_call(
        _gemm_bias_relu_kernel,
        out_shape=jax.ShapeDtypeStruct((Mp, N), jnp.bfloat16),
        grid=(Mp // chunk,),
        in_specs=[
            pl.BlockSpec((chunk, K), lambda i: (i, 0)),
            pl.BlockSpec((K, N), lambda i: (0, 0)),      # weight stays VMEM-resident
            pl.BlockSpec((1, N), lambda i: (0, 0)),      # folded-BN shift
        ],
        out_specs=pl.BlockSpec((chunk, N), lambda i: (i, 0)),
        compiler_params=pltpu.CompilerParams(dimension_semantics=("parallel",)),
    )(patches, w, shift)
    return out[:M] if Mp != M else out


# ---------------------------------------------------------------------------
# XLA-side glue: im2col (tap folding + stride handling), max-pool, gaussian cond.
# ---------------------------------------------------------------------------
def im2col(x, kh, kw, stride, pad, cin=None):
    """x: (B, H, W, C) -> ((B*OH*OW, Kp) bf16 patch matrix, OH, OW).
       K = kh*kw*cin (tap-major, channel-minor), zero-padded up to a multiple of 128."""
    B, H, W, C = x.shape
    if cin is not None and cin != C:
        x = x[..., :cin]
        C = cin
    OH = conv_out(H, kh, stride, pad)
    OW = conv_out(W, kw, stride, pad)
    xp = jnp.pad(x, ((0, 0), (pad, pad), (pad, pad), (0, 0)))
    taps = []
    for i in range(kh):
        for j in range(kw):
            taps.append(lax.slice(
                xp, (0, i, j, 0),
                (B, i + (OH - 1) * stride + 1, j + (OW - 1) * stride + 1, C),
                (1, stride, stride, 1)))
    patches = jnp.stack(taps, axis=3)                     # (B, OH, OW, kh*kw, C)
    patches = patches.reshape(B * OH * OW, kh * kw * C)
    K = kh * kw * C
    Kp = round_up(K, 128)
    if Kp != K:
        patches = jnp.pad(patches, ((0, 0), (0, Kp - K)))
    return patches.astype(jnp.bfloat16), OH, OW


def conv_bn_relu(x, w_folded, shift, *, kh, kw, stride, pad, cin=None, chunk=256):
    """NHWC conv + folded BatchNorm + ReLU as one tap-folded GEMM per row chunk."""
    B = x.shape[0]
    patches, OH, OW = im2col(x, kh, kw, stride, pad, cin=cin)
    out = gemm_bias_relu(patches, w_folded, shift, chunk=chunk)
    return out.reshape(B, OH, OW, OC_PAD)


def maxpool_nhwc(x, k, s, p):
    # TODO(synk): MaxPool2d stays as lax.reduce_window glue (not fused into the conv epilogue).
    return lax.reduce_window(
        x, jnp.array(-jnp.inf, x.dtype), lax.max,
        window_dimensions=(1, k, k, 1),
        window_strides=(1, s, s, 1),
        padding=[(0, 0), (p, p), (p, p), (0, 0)],
    )


def gaussian_target_nhwc(img_shape, pos, max_x, min_x, max_y, min_y, sigma=None):
    """Gaussian heatmap channel centered at the (x, y) position mapped to pixels."""
    _, H, W = img_shape
    if sigma is None:
        sigma = H / 16.0
    pos = pos.astype(jnp.float32)
    cx = (pos[:, 0] - min_x) / (max_x - min_x) * (W - 1)     # (B,)
    cy = (pos[:, 1] - min_y) / (max_y - min_y) * (H - 1)     # (B,)
    yy = jnp.arange(H, dtype=jnp.float32)[None, :, None]
    xx = jnp.arange(W, dtype=jnp.float32)[None, None, :]
    g = jnp.exp(-(((xx - cx[:, None, None]) ** 2) + ((yy - cy[:, None, None]) ** 2))
                / (2.0 * sigma ** 2))
    return g[..., None]                                      # (B, H, W, 1)


# ---------------------------------------------------------------------------
# One-time parameter preparation (outside the jitted forward).
# ---------------------------------------------------------------------------
def fold_conv_bn(w, bn):
    """PyTorch (oc, ic, kh, kw) conv weight + eval-mode BN running stats ->
       (Kp, 128) bf16 tap-folded weight (K tap-major/channel-minor) and (1, 128) f32 shift.
       TODO(synk): assumes BatchNorm in eval mode (running statistics)."""
    oc, ic, kh, kw = w.shape
    gamma, beta, mean, var = bn
    scale = gamma / jnp.sqrt(var + BN_EPS)
    shift = beta - mean * scale
    wf = jnp.transpose(w, (2, 3, 1, 0)).reshape(kh * kw * ic, oc) * scale
    K = kh * kw * ic
    Kp = round_up(K, 128)
    wf = jnp.pad(wf, ((0, Kp - K), (0, OC_PAD - oc)))
    shift = jnp.pad(shift, (0, OC_PAD - oc))
    return wf.astype(jnp.bfloat16), shift.reshape(1, OC_PAD).astype(jnp.float32)


def fold_params(params):
    w1, b1 = fold_conv_bn(params["conv1_w"], params["bn1"])
    w2, b2 = fold_conv_bn(params["conv2_w"], params["bn2"])
    w3, b3 = fold_conv_bn(params["conv3_w"], params["bn3"])
    return {"w1": w1, "b1": b1, "w2": w2, "b2": b2, "w3": w3, "b3": b3,
            "fc1_w": params["fc1_w"], "fc1_b": params["fc1_b"]}


# ---------------------------------------------------------------------------
# Forward pass: encode_cvae(x, t, r)[0]  (mu)
# ---------------------------------------------------------------------------
def cvae_forward(folded, x, tar_pos, robot_pos, *, img_shape):
    B = x.shape[0]
    tgt = gaussian_target_nhwc(img_shape, tar_pos, MAX_X, MIN_X, MAX_Y, MIN_Y)
    rob = gaussian_target_nhwc(img_shape, robot_pos, MAX_X, MIN_X, MAX_Y, MIN_Y)
    # single NCHW->NHWC transpose at the top; everything downstream stays NHWC
    h = jnp.concatenate([jnp.transpose(x, (0, 2, 3, 1)), tgt, rob], axis=-1)
    h = h.astype(jnp.bfloat16)                                # (B, H, W, C+2)

    # encoder_conv_new (BatchNorm folded, ReLU fused into the GEMM epilogue)
    h = conv_bn_relu(h, folded["w1"], folded["b1"], kh=7, kw=7, stride=2, pad=3)
    h = maxpool_nhwc(h, 3, 2, 1)
    h = conv_bn_relu(h, folded["w2"], folded["b2"], kh=3, kw=3, stride=1, pad=1, cin=64)
    h = maxpool_nhwc(h, 3, 2, 0)
    h = conv_bn_relu(h, folded["w3"], folded["b3"], kh=3, kw=3, stride=2, pad=1, cin=64)
    h = maxpool_nhwc(h, 3, 2, 0)                              # (B, fh, fw, 128)

    # drop the zero pad lanes and flatten in PyTorch NCHW order for encoder_fc1
    feat = jnp.transpose(h[..., :64].astype(jnp.float32), (0, 3, 1, 2)).reshape(B, -1)
    # mu head: N = state_dim = 2 is far too narrow for a 128-lane GEMM -> plain dot.
    mu = feat @ folded["fc1_w"].T + folded["fc1_b"]
    return mu


# ---------------------------------------------------------------------------
# Deterministic synthetic parameters (shapes from CNNCVAE_NEW.__init__)
# ---------------------------------------------------------------------------
def init_params(key, in_ch, state_dim, feat_dim):
    ks = jax.random.split(key, 8)

    def conv_w(k, oc, ic, kh, kw):
        fan_in = ic * kh * kw
        return (jax.random.normal(k, (oc, ic, kh, kw), jnp.float32)
                * jnp.sqrt(2.0 / fan_in))

    def bn(k):
        k1, k2, k3, k4 = jax.random.split(k, 4)
        gamma = 1.0 + 0.05 * jax.random.normal(k1, (64,), jnp.float32)
        beta = 0.05 * jax.random.normal(k2, (64,), jnp.float32)
        mean = 0.05 * jax.random.normal(k3, (64,), jnp.float32)
        var = 1.0 + 0.05 * jax.random.uniform(k4, (64,), jnp.float32)
        return (gamma, beta, mean, var)

    return {
        "conv1_w": conv_w(ks[0], 64, in_ch, 7, 7),
        "bn1": bn(ks[1]),
        "conv2_w": conv_w(ks[2], 64, 64, 3, 3),
        "bn2": bn(ks[3]),
        "conv3_w": conv_w(ks[4], 64, 64, 3, 3),
        "bn3": bn(ks[5]),
        "fc1_w": jax.random.normal(ks[6], (state_dim, feat_dim), jnp.float32)
                 / jnp.sqrt(feat_dim),
        "fc1_b": 0.01 * jax.random.normal(ks[7], (state_dim,), jnp.float32),
    }


if __name__ == "__main__":
    key = jax.random.PRNGKey(0)
    B = 2
    img_shape = (3, 64, 64)   # small version of the (3, 224, 224) default
    state_dim = 2

    # spatial dims after encoder_conv_new (64 -> 32 -> 16 -> 16 -> 7 -> 4 -> 1)
    s = img_shape[1]
    s = conv_out(s, 7, 2, 3)
    s = conv_out(s, 3, 2, 1)
    s = conv_out(s, 3, 1, 1)
    s = conv_out(s, 3, 2, 0)
    s = conv_out(s, 3, 2, 1)
    s = conv_out(s, 3, 2, 0)
    feat_dim = 64 * s * s

    k_x, k_t, k_r, k_p = jax.random.split(key, 4)
    x = jax.random.normal(k_x, (B,) + img_shape, jnp.float32)
    tar_pos = jax.random.uniform(k_t, (B, 2), minval=MIN_X, maxval=MAX_X)
    robot_pos = jax.random.uniform(k_r, (B, 2), minval=MIN_X, maxval=MAX_X)

    params = init_params(k_p, img_shape[0] + 2, state_dim, feat_dim)
    folded = fold_params(params)   # BN folding / weight packing hoisted out of the hot path

    fwd = jax.jit(functools.partial(cvae_forward, img_shape=img_shape))
    mu = fwd(folded, x, tar_pos, robot_pos)
    mu = jax.block_until_ready(mu)
    assert mu.shape == (B, state_dim), mu.shape
    print("KERNEL_OK")
</pallas_src>

<mosaic_0001>
module attributes {stable_mosaic.version = 11 : i64} {
  func.func @_gemm_bias_relu_kernel(%arg0: i32, %arg1: memref<256x256xbf16, #tpu.memory_space<vmem>>, %arg2: memref<256x128xbf16, #tpu.memory_space<vmem>>, %arg3: memref<1x128xf32, #tpu.memory_space<vmem>>, %arg4: memref<256x128xbf16, #tpu.memory_space<vmem>>) attributes {dimension_semantics = [#tpu.dimension_semantics<parallel>], iteration_bounds = array<i64: 8>, scalar_prefetch = 0 : i64, scratch_operands = 0 : i64, tpu.core_type = #tpu.core_type<tc>, window_params = [{transform_indices = @transform_0, window_bounds = array<i64: 256, 256>}, {pipeline_mode = #tpu.pipeline_mode<synchronous>, transform_indices = @transform_1, window_bounds = array<i64: 256, 128>}, {pipeline_mode = #tpu.pipeline_mode<synchronous>, transform_indices = @transform_2, window_bounds = array<i64: 1, 128>}, {transform_indices = @transform_3, window_bounds = array<i64: 256, 128>}]} {
    %c0 = arith.constant 0 : index
    %c0_0 = arith.constant 0 : index
    %0 = vector.load %arg1[%c0, %c0_0] : memref<256x256xbf16, #tpu.memory_space<vmem>>, vector<256x256xbf16>
    %c0_1 = arith.constant 0 : index
    %c0_2 = arith.constant 0 : index
    %1 = vector.load %arg2[%c0_1, %c0_2] : memref<256x128xbf16, #tpu.memory_space<vmem>>, vector<256x128xbf16>
    %cst = arith.constant dense<0.000000e+00> : vector<256x128xf32>
    %2 = tpu.matmul %0, %1, %cst {dimension_numbers = #tpu.dot_dimension_numbers<[1], [0], [0], [1], [0, 0, 1, 1], [], []>} : vector<256x256xbf16>, vector<256x128xbf16>, vector<256x128xf32> -> vector<256x128xf32>
    %c0_3 = arith.constant 0 : index
    %c0_4 = arith.constant 0 : index
    %3 = vector.load %arg3[%c0_3, %c0_4] : memref<1x128xf32, #tpu.memory_space<vmem>>, vector<1x128xf32>
    %4 = vector.broadcast %3 : vector<1x128xf32> to vector<256x128xf32>
    %5 = arith.addf %2, %4 : vector<256x128xf32>
    %cst_5 = arith.constant 0.000000e+00 : f32
    %6 = vector.broadcast %cst_5 : f32 to vector<256x128xf32>
    %7 = arith.maximumf %5, %6 : vector<256x128xf32>
    %8 = arith.truncf %7 : vector<256x128xf32> to vector<256x128xbf16>
    %c0_6 = arith.constant 0 : index
    %c0_7 = arith.constant 0 : index
    %9 = vector.load %arg4[%c0_6, %c0_7] : memref<256x128xbf16, #tpu.memory_space<vmem>>, vector<256x128xbf16>
    tpu.vector_store %arg4[%c0_6, %c0_7], %8 {strides = array<i32>} : memref<256x128xbf16, #tpu.memory_space<vmem>>, vector<256x128xbf16>,
    return
  }
  func.func @transform_0(%arg0: i32) -> (i32, i32) {
    %c0_i32 = arith.constant 0 : i32
    %c0_i32_0 = arith.constant 0 : i32
    return %arg0, %c0_i32 : i32, i32
  }
  func.func @transform_1(%arg0: i32) -> (i32, i32) {
    %c0_i32 = arith.constant 0 : i32
    %c0_i32_0 = arith.constant 0 : i32
    %c0_i32_1 = arith.constant 0 : i32
    return %c0_i32, %c0_i32_0 : i32, i32
  }
  func.func @transform_2(%arg0: i32) -> (i32, i32) {
    %c0_i32 = arith.constant 0 : i32
    %c0_i32_0 = arith.constant 0 : i32
    %c0_i32_1 = arith.constant 0 : i32
    return %c0_i32, %c0_i32_0 : i32, i32
  }
  func.func @transform_3(%arg0: i32) -> (i32, i32) {
    %c0_i32 = arith.constant 0 : i32
    %c0_i32_0 = arith.constant 0 : i32
    return %arg0, %c0_i32 : i32, i32
  }
}

module attributes {stable_mosaic.version = 11 : i64} {
  func.func @_gemm_bias_relu_kernel(%arg0: i32, %arg1: memref<256x640xbf16, #tpu.memory_space<vmem>>, %arg2: memref<640x128xbf16, #tpu.memory_space<vmem>>, %arg3: memref<1x128xf32, #tpu.memory_space<vmem>>, %arg4: memref<256x128xbf16, #tpu.memory_space<vmem>>) attributes {dimension_semantics = [#tpu.dimension_semantics<parallel>], iteration_bounds = array<i64: 2>, scalar_prefetch = 0 : i64, scratch_operands = 0 : i64, tpu.core_type = #tpu.core_type<tc>, window_params = [{transform_indices = @transform_0, window_bounds = array<i64: 256, 640>}, {pipeline_mode = #tpu.pipeline_mode<synchronous>, transform_indices = @transform_1, window_bounds = array<i64: 640, 128>}, {pipeline_mode = #tpu.pipeline_mode<synchronous>, transform_indices = @transform_2, window_bounds = array<i64: 1, 128>}, {transform_indices = @transform_3, window_bounds = array<i64: 256, 128>}]} {
    %c0 = arith.constant 0 : index
    %c0_0 = arith.constant 0 : index
    %0 = vector.load %arg1[%c0, %c0_0] : memref<256x640xbf16, #tpu.memory_space<vmem>>, vector<256x640xbf16>
    %c0_1 = arith.constant 0 : index
    %c0_2 = arith.constant 0 : index
    %1 = vector.load %arg2[%c0_1, %c0_2] : memref<640x128xbf16, #tpu.memory_space<vmem>>, vector<640x128xbf16>
    %cst = arith.constant dense<0.000000e+00> : vector<256x128xf32>
    %2 = tpu.matmul %0, %1, %cst {dimension_numbers = #tpu.dot_dimension_numbers<[1], [0], [0], [1], [0, 0, 1, 1], [], []>} : vector<256x640xbf16>, vector<640x128xbf16>, vector<256x128xf32> -> vector<256x128xf32>
    %c0_3 = arith.constant 0 : index
    %c0_4 = arith.constant 0 : index
    %3 = vector.load %arg3[%c0_3, %c0_4] : memref<1x128xf32, #tpu.memory_space<vmem>>, vector<1x128xf32>
    %4 = vector.broadcast %3 : vector<1x128xf32> to vector<256x128xf32>
    %5 = arith.addf %2, %4 : vector<256x128xf32>
    %cst_5 = arith.constant 0.000000e+00 : f32
    %6 = vector.broadcast %cst_5 : f32 to vector<256x128xf32>
    %7 = arith.maximumf %5, %6 : vector<256x128xf32>
    %8 = arith.truncf %7 : vector<256x128xf32> to vector<256x128xbf16>
    %c0_6 = arith.constant 0 : index
    %c0_7 = arith.constant 0 : index
    %9 = vector.load %arg4[%c0_6, %c0_7] : memref<256x128xbf16, #tpu.memory_space<vmem>>, vector<256x128xbf16>
    tpu.vector_store %arg4[%c0_6, %c0_7], %8 {strides = array<i32>} : memref<256x128xbf16, #tpu.memory_space<vmem>>, vector<256x128xbf16>,
    return
  }
  func.func @transform_0(%arg0: i32) -> (i32, i32) {
    %c0_i32 = arith.constant 0 : i32
    %c0_i32_0 = arith.constant 0 : i32
    return %arg0, %c0_i32 : i32, i32
  }
  func.func @transform_1(%arg0: i32) -> (i32, i32) {
    %c0_i32 = arith.constant 0 : i32
    %c0_i32_0 = arith.constant 0 : i32
    %c0_i32_1 = arith.constant 0 : i32
    return %c0_i32, %c0_i32_0 : i32, i32
  }
  func.func @transform_2(%arg0: i32) -> (i32, i32) {
    %c0_i32 = arith.constant 0 : i32
    %c0_i32_0 = arith.constant 0 : i32
    %c0_i32_1 = arith.constant 0 : i32
    return %c0_i32, %c0_i32_0 : i32, i32
  }
  func.func @transform_3(%arg0: i32) -> (i32, i32) {
    %c0_i32 = arith.constant 0 : i32
    %c0_i32_0 = arith.constant 0 : i32
    return %arg0, %c0_i32 : i32, i32
  }
}

module attributes {stable_mosaic.version = 11 : i64} {
  func.func @_gemm_bias_relu_kernel(%arg0: i32, %arg1: memref<32x640xbf16, #tpu.memory_space<vmem>>, %arg2: memref<640x128xbf16, #tpu.memory_space<vmem>>, %arg3: memref<1x128xf32, #tpu.memory_space<vmem>>, %arg4: memref<32x128xbf16, #tpu.memory_space<vmem>>) attributes {dimension_semantics = [#tpu.dimension_semantics<parallel>], iteration_bounds = array<i64: 1>, scalar_prefetch = 0 : i64, scratch_operands = 0 : i64, tpu.core_type = #tpu.core_type<tc>, window_params = [{transform_indices = @transform_0, window_bounds = array<i64: 32, 640>}, {pipeline_mode = #tpu.pipeline_mode<synchronous>, transform_indices = @transform_1, window_bounds = array<i64: 640, 128>}, {pipeline_mode = #tpu.pipeline_mode<synchronous>, transform_indices = @transform_2, window_bounds = array<i64: 1, 128>}, {transform_indices = @transform_3, window_bounds = array<i64: 32, 128>}]} {
    %c0 = arith.constant 0 : index
    %c0_0 = arith.constant 0 : index
    %0 = vector.load %arg1[%c0, %c0_0] : memref<32x640xbf16, #tpu.memory_space<vmem>>, vector<32x640xbf16>
    %c0_1 = arith.constant 0 : index
    %c0_2 = arith.constant 0 : index
    %1 = vector.load %arg2[%c0_1, %c0_2] : memref<640x128xbf16, #tpu.memory_space<vmem>>, vector<640x128xbf16>
    %cst = arith.constant dense<0.000000e+00> : vector<32x128xf32>
    %2 = tpu.matmul %0, %1, %cst {dimension_numbers = #tpu.dot_dimension_numbers<[1], [0], [0], [1], [0, 0, 1, 1], [], []>} : vector<32x640xbf16>, vector<640x128xbf16>, vector<32x128xf32> -> vector<32x128xf32>
    %c0_3 = arith.constant 0 : index
    %c0_4 = arith.constant 0 : index
    %3 = vector.load %arg3[%c0_3, %c0_4] : memref<1x128xf32, #tpu.memory_space<vmem>>, vector<1x128xf32>
    %4 = vector.broadcast %3 : vector<1x128xf32> to vector<32x128xf32>
    %5 = arith.addf %2, %4 : vector<32x128xf32>
    %cst_5 = arith.constant 0.000000e+00 : f32
    %6 = vector.broadcast %cst_5 : f32 to vector<32x128xf32>
    %7 = arith.maximumf %5, %6 : vector<32x128xf32>
    %8 = arith.truncf %7 : vector<32x128xf32> to vector<32x128xbf16>
    %c0_6 = arith.constant 0 : index
    %c0_7 = arith.constant 0 : index
    %9 = vector.load %arg4[%c0_6, %c0_7] : memref<32x128xbf16, #tpu.memory_space<vmem>>, vector<32x128xbf16>
    tpu.vector_store %arg4[%c0_6, %c0_7], %8 {strides = array<i32>} : memref<32x128xbf16, #tpu.memory_space<vmem>>, vector<32x128xbf16>,
    return
  }
  func.func @transform_0(%arg0: i32) -> (i32, i32) {
    %c0_i32 = arith.constant 0 : i32
    %c0_i32_0 = arith.constant 0 : i32
    return %arg0, %c0_i32 : i32, i32
  }
  func.func @transform_1(%arg0: i32) -> (i32, i32) {
    %c0_i32 = arith.constant 0 : i32
    %c0_i32_0 = arith.constant 0 : i32
    %c0_i32_1 = arith.constant 0 : i32
    return %c0_i32, %c0_i32_0 : i32, i32
  }
  func.func @transform_2(%arg0: i32) -> (i32, i32) {
    %c0_i32 = arith.constant 0 : i32
    %c0_i32_0 = arith.constant 0 : i32
    %c0_i32_1 = arith.constant 0 : i32
    return %c0_i32, %c0_i32_0 : i32, i32
  }
  func.func @transform_3(%arg0: i32) -> (i32, i32) {
    %c0_i32 = arith.constant 0 : i32
    %c0_i32_0 = arith.constant 0 : i32
    return %arg0, %c0_i32 : i32, i32
  }
}

</mosaic_0001>

<bundles_post_ra>
// kernel: cvae_forward.3
= control target key start
LH: loop header
LB: loop body
LE: loop exit
PB: predicated region body
PF: predicated region fallthrough
CT: control target
= control target key end

     0   :  { %s1363_s12 = smov 0   ;;  %s1521_s0 = inlined_call_operand.vmem [shape: bf16[2048,256], index: 0, kind: input, shape index: {}]   ;;  %s1522_s1 = inlined_call_operand.vmem [shape: bf16[256,128], index: 1, kind: input, shape index: {}]   ;;  %s1523_s2 = inlined_call_operand.vmem [shape: f32[1,128], index: 2, kind: input, shape index: {}]   ;;  %s1524_s3 = inlined_call_operand.vmem [shape: bf16[2048,128], index: 3, kind: output, shape index: {}]  }
   0x1 LB: > { %s914_s13 = sadd.s32 4294967295, %s1341_s12   ;;  %p918_p0 = scmp.ge.s32.totalorder %s1341_s12, 1  ;;  %s1341_s12 = sphi %s1363_s12, %s13_s12  }
   0x2   : > { %p139_p1 = scmp.lt.s32.totalorder %s1341_s12, 9 }
   0x4   : > { %p140_p2 = pnand %p918_p0, %p139_p1 }
   0x5   : > { %s919_s16 = sshll.u32 (!%p140_p2), %s914_s13, 5 }
   0x6   : > { %143 = sbr.rel (%p140_p2) target bundleno = 308 (0x134), region = 32  ;;  %p165_p3 = scmp.lt.s32.totalorder (!%p140_p2), %s919_s16, 255 }
   0xb   : > { %v1271_v0 = vld [vmem:[%s1522_s1 + $0x78] sm:$0xff]   ;;  %v1273_v2 = vld [vmem:[%s1522_s1 + $0x70] sm:$0xff]   ;;  %v1275_v4 = vld [vmem:[%s1522_s1 + $0x68] sm:$0xff]   ;;  %s1526_s16 = smov (!%p165_p3, %s919_s16), 255 }
   0xc   : > { %v1272_v1 = vld [vmem:[%s1522_s1 + $0x38] sm:$0xff]   ;;  %1135 = vmatprep.subr.bf16.mxu0 %v1271_v0  ;;  %1247 = vmatprep.subr.bf16.mxu1 %v1271_v0  ;;  %v1274_v3 = vld [vmem:[%s1522_s1 + $0x30] sm:$0xff]   ;;  %v1276_v5 = vld [vmem:[%s1522_s1 + $0x28] sm:$0xff]   ;;  %s1007_s4 = sshll.u32 %s1526_s16, 3  ;;  %s923_s28 = sshll.u32 %s1526_s16, 2 }
   0xd   : > { %1136 = vmatpush3.bf16.msra.mxu0 %v1272_v1  ;;  %1255 = vmatpush3.bf16.msra.mxu1 %v1272_v1  ;;  %v1277_v6 = vld [vmem:[%s1522_s1 + $0x60] sm:$0xff]   ;;  %v1279_v8 = vld [vmem:[%s1522_s1 + $0x58] sm:$0xff]   ;;  %s1404_s9 = scalar_lea.vmem %s1521_s0, %s1007_s4  ;;  %v1281_v10 = vld [vmem:[%s1522_s1 + $0x50] sm:$0xff]   ;;  %s1472_s4 = scalar_lea.vmem %s1524_s3, %s923_s28 }
   0xe   : > { %1137 = vmatprep.subr.bf16.mxu0 %v1273_v2  ;;  %1248 = vmatprep.subr.bf16.mxu1 %v1273_v2  ;;  %v1278_v7 = vld [vmem:[%s1522_s1 + $0x20] sm:$0xff]   ;;  %v1280_v9 = vld [vmem:[%s1522_s1 + $0x18] sm:$0xff]   ;;  %v1282_v13 = vld [vmem:[%s1522_s1 + $0x10] sm:$0xff]  }
   0xf   : > { %v1289_v11 = vld [vmem:[%s1404_s9 + $0x4] ss:$8 sps:$4 sm:$0xff]   ;;  %v1287_v18 = vld [vmem:[%s1404_s9] ss:$8 sps:$4 sm:$0xff]   ;;  %v1293_v20 = vld [vmem:[%s1404_s9 + $0x14] ss:$8 sps:$4 sm:$0xff]  }
  0x10   : > { %v1292_v12 = vld [vmem:[%s1404_s9 + $0x84] ss:$8 sps:$4 sm:$0xff]   ;;  %537 = vmatprep.mubr.bf16.mxu0 %v1289_v11  ;;  %v1290_v19 = vld [vmem:[%s1404_s9 + $0x80] ss:$8 sps:$4 sm:$0xff]   ;;  %v1295_v21 = vld [vmem:[%s1404_s9 + $0x94] ss:$8 sps:$4 sm:$0xff]  }
  0x11   : > { %1138 = vmatpush3.bf16.msra.mxu0 %v1274_v3  ;;  %1256 = vmatpush3.bf16.msra.mxu1 %v1274_v3  ;;  %v1283_v14 = vld [vmem:[%s1522_s1 + $0x48] sm:$0xff]   ;;  %v1285_v16 = vld [vmem:[%s1522_s1 + $0x40] sm:$0xff]   ;;  %v1297_v22 = vld [vmem:[%s1404_s9 + $0x10] ss:$8 sps:$4 sm:$0xff]  }
  0x12   : > { %1139 = vmatprep.subr.bf16.mxu0 %v1275_v4  ;;  %1249 = vmatprep.subr.bf16.mxu1 %v1275_v4  ;;  %v1284_v15 = vld [vmem:[%s1522_s1 + $0x8] sm:$0xff]   ;;  %v1286_v17 = vld [vmem:[%s1522_s1] sm:$0xff]   ;;  %v1298_v23 = vld [vmem:[%s1404_s9 + $0x90] ss:$8 sps:$4 sm:$0xff]  }
  0x13   : > { %601 = vmatprep.mubr.bf16.mxu1 %v1292_v12  ;;  %v1299_v24 = vld [vmem:[%s1404_s9 + $0x24] ss:$8 sps:$4 sm:$0xff]   ;;  %v1303_v26 = vld [vmem:[%s1404_s9 + $0x20] ss:$8 sps:$4 sm:$0xff]   ;;  %v1305_v28 = vld [vmem:[%s1404_s9 + $0x34] ss:$8 sps:$4 sm:$0xff]  }
  0x14   : > { %v1301_v25 = vld [vmem:[%s1404_s9 + $0xa4] ss:$8 sps:$4 sm:$0xff]   ;;  %v1304_v27 = vld [vmem:[%s1404_s9 + $0xa0] ss:$8 sps:$4 sm:$0xff]   ;;  %v1307_v29 = vld [vmem:[%s1404_s9 + $0xb4] ss:$8 sps:$4 sm:$0xff]  }
  0x15   : > { %1140 = vmatpush3.bf16.msra.mxu0 %v1276_v5  ;;  %1257 = vmatpush3.bf16.msra.mxu1 %v1276_v5  ;;  %v1309_v30 = vld [vmem:[%s1404_s9 + $0x30] ss:$8 sps:$4 sm:$0xff]   ;;  %v1311_v32 = vld [vmem:[%s1404_s9 + $0x44] ss:$8 sps:$4 sm:$0xff]   ;;  %v1315_v34 = vld [vmem:[%s1404_s9 + $0x40] ss:$8 sps:$4 sm:$0xff]  }
  0x16   : > { %1141 = vmatprep.subr.bf16.mxu0 %v1277_v6  ;;  %1250 = vmatprep.subr.bf16.mxu1 %v1277_v6  ;;  %v1310_v31 = vld [vmem:[%s1404_s9 + $0xb0] ss:$8 sps:$4 sm:$0xff]   ;;  %v1313_v33 = vld [vmem:[%s1404_s9 + $0xc4] ss:$8 sps:$4 sm:$0xff]   ;;  %v1316_v35 = vld [vmem:[%s1404_s9 + $0xc0] ss:$8 sps:$4 sm:$0xff]  }
  0x17   : > { %v1317_v36 = vld [vmem:[%s1404_s9 + $0x54] ss:$8 sps:$4 sm:$0xff]   ;;  %v1321_v38 = vld [vmem:[%s1404_s9 + $0x50] ss:$8 sps:$4 sm:$0xff]   ;;  %v1323_v40 = vld [vmem:[%s1404_s9 + $0x64] ss:$8 sps:$4 sm:$0xff]  }
  0x18   : > { %v1319_v37 = vld [vmem:[%s1404_s9 + $0xd4] ss:$8 sps:$4 sm:$0xff]   ;;  %v1322_v39 = vld [vmem:[%s1404_s9 + $0xd0] ss:$8 sps:$4 sm:$0xff]   ;;  %v1325_v41 = vld [vmem:[%s1404_s9 + $0xe4] ss:$8 sps:$4 sm:$0xff]  }
  0x19   : > { %1142 = vmatpush3.bf16.msra.mxu0 %v1278_v7  ;;  %1258 = vmatpush3.bf16.msra.mxu1 %v1278_v7  ;;  %v1327_v42 = vld [vmem:[%s1404_s9 + $0x60] ss:$8 sps:$4 sm:$0xff]   ;;  %v1329_v44 = vld [vmem:[%s1404_s9 + $0x74] ss:$8 sps:$4 sm:$0xff]   ;;  %v1333_v46 = vld [vmem:[%s1404_s9 + $0x70] ss:$8 sps:$4 sm:$0xff]  }
  0x1a   : > { %1143 = vmatprep.subr.bf16.mxu0 %v1279_v8  ;;  %1251 = vmatprep.subr.bf16.mxu1 %v1279_v8  ;;  %v1328_v43 = vld [vmem:[%s1404_s9 + $0xe0] ss:$8 sps:$4 sm:$0xff]   ;;  %v1331_v45 = vld [vmem:[%s1404_s9 + $0xf4] ss:$8 sps:$4 sm:$0xff]   ;;  %v1334_v47 = vld [vmem:[%s1404_s9 + $0xf0] ss:$8 sps:$4 sm:$0xff]  }
  0x1b   : > { %v1462_v52 = vld [vmem:[%s1523_s2] ss:$0 sm:$0xff] }
  0x1d   : > { %1144 = vmatpush3.bf16.msra.mxu0 %v1280_v9  ;;  %1259 = vmatpush3.bf16.msra.mxu1 %v1280_v9 }
  0x1e   : > { %1145 = vmatprep.subr.bf16.mxu0 %v1281_v10  ;;  %1252 = vmatprep.subr.bf16.mxu1 %v1281_v10 }
  0x21   : > { %1146 = vmatpush3.bf16.msra.mxu0 %v1282_v13  ;;  %1260 = vmatpush3.bf16.msra.mxu1 %v1282_v13 }
  0x22   : > { %1147 = vmatprep.subr.bf16.mxu0 %v1283_v14  ;;  %1253 = vmatprep.subr.bf16.mxu1 %v1283_v14 }
  0x25   : > { %1148 = vmatpush3.bf16.msra.mxu0 %v1284_v15  ;;  %1261 = vmatpush3.bf16.msra.mxu1 %v1284_v15 }
  0x26   : > { %1149 = vmatprep.subr.bf16.mxu0 %v1285_v16  ;;  %1254 = vmatprep.subr.bf16.mxu1 %v1285_v16 }
  0x29   : > { %1150 = vmatpush3.bf16.msra.mxu0 %v1286_v17  ;;  %1262 = vmatpush3.bf16.msra.mxu1 %v1286_v17 }
  0x2c   : > { %538 = vmatmul.mubr.bf16.vlgmr.msra.gmra.mxu0 %v1287_v18  ;;  %602 = vmatmul.mubr.bf16.vlgmr.msra.gmra.mxu1 %v1290_v19 }
  0x2d   : > { %545 = vmatprep.mubr.bf16.mxu0 %v1293_v20  ;;  %609 = vmatprep.mubr.bf16.mxu1 %v1295_v21 }
  0x34   : > { %546 = vmatmul.mubr.bf16.gmra.mxu0 %v1297_v22  ;;  %610 = vmatmul.mubr.bf16.gmra.mxu1 %v1298_v23 }
  0x35   : > { %553 = vmatprep.mubr.bf16.mxu0 %v1299_v24  ;;  %617 = vmatprep.mubr.bf16.mxu1 %v1301_v25 }
  0x3c   : > { %554 = vmatmul.mubr.bf16.gmra.mxu0 %v1303_v26  ;;  %618 = vmatmul.mubr.bf16.gmra.mxu1 %v1304_v27 }
  0x3d   : > { %561 = vmatprep.mubr.bf16.mxu0 %v1305_v28  ;;  %625 = vmatprep.mubr.bf16.mxu1 %v1307_v29 }
  0x44   : > { %562 = vmatmul.mubr.bf16.gmra.mxu0 %v1309_v30  ;;  %626 = vmatmul.mubr.bf16.gmra.mxu1 %v1310_v31 }
  0x45   : > { %569 = vmatprep.mubr.bf16.mxu0 %v1311_v32  ;;  %633 = vmatprep.mubr.bf16.mxu1 %v1313_v33 }
  0x4c   : > { %570 = vmatmul.mubr.bf16.gmra.mxu0 %v1315_v34  ;;  %634 = vmatmul.mubr.bf16.gmra.mxu1 %v1316_v35 }
  0x4d   : > { %577 = vmatprep.mubr.bf16.mxu0 %v1317_v36  ;;  %641 = vmatprep.mubr.bf16.mxu1 %v1319_v37 }
  0x54   : > { %578 = vmatmul.mubr.bf16.gmra.mxu0 %v1321_v38  ;;  %642 = vmatmul.mubr.bf16.gmra.mxu1 %v1322_v39 }
  0x55   : > { %585 = vmatprep.mubr.bf16.mxu0 %v1323_v40  ;;  %649 = vmatprep.mubr.bf16.mxu1 %v1325_v41 }
  0x5c   : > { %586 = vmatmul.mubr.bf16.gmra.mxu0 %v1327_v42  ;;  %650 = vmatmul.mubr.bf16.gmra.mxu1 %v1328_v43 }
  0x5d   : > { %593 = vmatprep.mubr.bf16.mxu0 %v1329_v44  ;;  %657 = vmatprep.mubr.bf16.mxu1 %v1331_v45 }
  0x64   : > { %594 = vmatmul.mubr.bf16.gmra.mxu0 %v1333_v46  ;;  %658 = vmatmul.mubr.bf16.gmra.mxu1 %v1334_v47 }
  0xec   : > { %v1151_v48 = vpop.f32.mrf.mxu0  ;;  %v1199_v49 = vpop.f32.mrf.mxu1 }
  0xee   : > { %v1152_v50 = vpop.f32.mrf.mxu0  ;;  %v1200_v51 = vpop.f32.mrf.mxu1 }
  0xef   : > { %v1153_v53 = vadd.f32 %v1152_v50, %v1151_v48  ;;  %v1201_v54 = vadd.f32 %v1200_v51, %v1199_v49 }
  0xf0   : > { %v1154_v55 = vpop.f32.mrf.mxu0  ;;  %v1202_v56 = vpop.f32.mrf.mxu1 }
  0xf1   : > { %v540_v57 = vadd.f32 %v1153_v53, %v1462_v52  ;;  %v604_v58 = vadd.f32 %v1201_v54, %v1462_v52 }
  0xf2   : > { %v1155_v59 = vpop.f32.mrf.mxu0  ;;  %v1203_v60 = vpop.f32.mrf.mxu1 }
  0xf3   : > { %v1156_v61 = vadd.f32 %v1155_v59, %v1154_v55  ;;  %v1204_v62 = vadd.f32 %v1203_v60, %v1202_v56  ;;  %v666_v3 = vmax.f32 %v540_v57, 0.0  ;;  %v682_v4 = vmax.f32 %v604_v58, 0.0 }
  0xf4   : > { %v1157_v63 = vpop.f32.mrf.mxu0  ;;  %v1205_v0 = vpop.f32.mrf.mxu1 }
  0xf5   : > { %v543_v1 = vadd.f32 %v1156_v61, %v1462_v52  ;;  %v607_v2 = vadd.f32 %v1204_v62, %v1462_v52 }
  0xf6   : > { %v1158_v5 = vpop.f32.mrf.mxu0  ;;  %v1206_v6 = vpop.f32.mrf.mxu1 }
  0xf7   : > { %v667_v7 = vmax.f32 %v543_v1, 0.0  ;;  %v683_v8 = vmax.f32 %v607_v2, 0.0  ;;  %v1159_v9 = vadd.f32 %v1158_v5, %v1157_v63  ;;  %v1207_v10 = vadd.f32 %v1206_v6, %v1205_v0 }
  0xf8   : > { %v1160_v11 = vpop.f32.mrf.mxu0  ;;  %v1208_v12 = vpop.f32.mrf.mxu1 }
  0xf9   : > { %v1043_v13 = vpack.c.bf16 %v667_v7, %v666_v3  ;;  %v1083_v14 = vpack.c.bf16 %v683_v8, %v682_v4  ;;  %v548_v15 = vadd.f32 %v1159_v9, %v1462_v52  ;;  %v612_v16 = vadd.f32 %v1207_v10, %v1462_v52 }
  0xfa   : > { %v1161_v17 = vpop.f32.mrf.mxu0  ;;  %v1209_v18 = vpop.f32.mrf.mxu1 }
  0xfb   : > { %1044 = vst [vmem:[%s1472_s4] sm:$0xff] %v1043_v13   ;;  %1127 = vst [vmem:[%s1472_s4 + $0x40] sm:$0xff] %v1083_v14   ;;  %v1162_v19 = vadd.f32 %v1161_v17, %v1160_v11  ;;  %v1210_v20 = vadd.f32 %v1209_v18, %v1208_v12  ;;  %v668_v25 = vmax.f32 %v548_v15, 0.0  ;;  %v684_v26 = vmax.f32 %v612_v16, 0.0 }
  0xfc   : > { %v1163_v21 = vpop.f32.mrf.mxu0  ;;  %v1211_v22 = vpop.f32.mrf.mxu1 }
  0xfd   : > { %v551_v23 = vadd.f32 %v1162_v19, %v1462_v52  ;;  %v615_v24 = vadd.f32 %v1210_v20, %v1462_v52 }
  0xfe   : > { %v1164_v27 = vpop.f32.mrf.mxu0  ;;  %v1212_v28 = vpop.f32.mrf.mxu1 }
  0xff   : > { %v669_v29 = vmax.f32 %v551_v23, 0.0  ;;  %v685_v30 = vmax.f32 %v615_v24, 0.0  ;;  %v1165_v31 = vadd.f32 %v1164_v27, %v1163_v21  ;;  %v1213_v32 = vadd.f32 %v1212_v28, %v1211_v22 }
 0x100   : > { %v1166_v33 = vpop.f32.mrf.mxu0  ;;  %v1214_v34 = vpop.f32.mrf.mxu1 }
 0x101   : > { %v1048_v35 = vpack.c.bf16 %v669_v29, %v668_v25  ;;  %v1088_v36 = vpack.c.bf16 %v685_v30, %v684_v26  ;;  %v556_v37 = vadd.f32 %v1165_v31, %v1462_v52  ;;  %v620_v38 = vadd.f32 %v1213_v32, %v1462_v52 }
 0x102   : > { %v1167_v39 = vpop.f32.mrf.mxu0  ;;  %v1215_v40 = vpop.f32.mrf.mxu1 }
 0x103   : > { %1120 = vst [vmem:[%s1472_s4 + $0x8] sm:$0xff] %v1048_v35   ;;  %1128 = vst [vmem:[%s1472_s4 + $0x48] sm:$0xff] %v1088_v36   ;;  %v1168_v41 = vadd.f32 %v1167_v39, %v1166_v33  ;;  %v1216_v42 = vadd.f32 %v1215_v40, %v1214_v34  ;;  %v670_v47 = vmax.f32 %v556_v37, 0.0  ;;  %v686_v48 = vmax.f32 %v620_v38, 0.0 }
 0x104   : > { %v1169_v43 = vpop.f32.mrf.mxu0  ;;  %v1217_v44 = vpop.f32.mrf.mxu1 }
 0x105   : > { %v559_v45 = vadd.f32 %v1168_v41, %v1462_v52  ;;  %v623_v46 = vadd.f32 %v1216_v42, %v1462_v52 }
 0x106   : > { %v1170_v49 = vpop.f32.mrf.mxu0  ;;  %v1218_v50 = vpop.f32.mrf.mxu1 }
 0x107   : > { %v671_v51 = vmax.f32 %v559_v45, 0.0  ;;  %v687_v53 = vmax.f32 %v623_v46, 0.0  ;;  %v1171_v54 = vadd.f32 %v1170_v49, %v1169_v43  ;;  %v1219_v55 = vadd.f32 %v1218_v50, %v1217_v44 }
 0x108   : > { %v1172_v56 = vpop.f32.mrf.mxu0  ;;  %v1220_v57 = vpop.f32.mrf.mxu1 }
 0x109   : > { %v1053_v58 = vpack.c.bf16 %v671_v51, %v670_v47  ;;  %v1093_v59 = vpack.c.bf16 %v687_v53, %v686_v48  ;;  %v564_v60 = vadd.f32 %v1171_v54, %v1462_v52  ;;  %v628_v61 = vadd.f32 %v1219_v55, %v1462_v52 }
 0x10a   : > { %v1173_v62 = vpop.f32.mrf.mxu0  ;;  %v1221_v63 = vpop.f32.mrf.mxu1 }
 0x10b   : > { %1121 = vst [vmem:[%s1472_s4 + $0x10] sm:$0xff] %v1053_v58   ;;  %1129 = vst [vmem:[%s1472_s4 + $0x50] sm:$0xff] %v1093_v59   ;;  %v1174_v0 = vadd.f32 %v1173_v62, %v1172_v56  ;;  %v1222_v1 = vadd.f32 %v1221_v63, %v1220_v57  ;;  %v672_v6 = vmax.f32 %v564_v60, 0.0  ;;  %v688_v7 = vmax.f32 %v628_v61, 0.0 }
 0x10c   : > { %v1175_v2 = vpop.f32.mrf.mxu0  ;;  %v1223_v3 = vpop.f32.mrf.mxu1 }
 0x10d   : > { %v567_v4 = vadd.f32 %v1174_v0, %v1462_v52  ;;  %v631_v5 = vadd.f32 %v1222_v1, %v1462_v52 }
 0x10e   : > { %v1176_v8 = vpop.f32.mrf.mxu0  ;;  %v1224_v9 = vpop.f32.mrf.mxu1 }
 0x10f   : > { %v673_v10 = vmax.f32 %v567_v4, 0.0  ;;  %v689_v11 = vmax.f32 %v631_v5, 0.0  ;;  %v1177_v12 = vadd.f32 %v1176_v8, %v1175_v2  ;;  %v1225_v13 = vadd.f32 %v1224_v9, %v1223_v3 }
 0x110   : > { %v1178_v14 = vpop.f32.mrf.mxu0  ;;  %v1226_v15 = vpop.f32.mrf.mxu1 }
 0x111   : > { %v1058_v16 = vpack.c.bf16 %v673_v10, %v672_v6  ;;  %v1098_v17 = vpack.c.bf16 %v689_v11, %v688_v7  ;;  %v572_v18 = vadd.f32 %v1177_v12, %v1462_v52  ;;  %v636_v19 = vadd.f32 %v1225_v13, %v1462_v52 }
 0x112   : > { %v1179_v20 = vpop.f32.mrf.mxu0  ;;  %v1227_v21 = vpop.f32.mrf.mxu1 }
 0x113   : > { %1122 = vst [vmem:[%s1472_s4 + $0x18] sm:$0xff] %v1058_v16   ;;  %1130 = vst [vmem:[%s1472_s4 + $0x58] sm:$0xff] %v1098_v17   ;;  %v1180_v22 = vadd.f32 %v1179_v20, %v1178_v14  ;;  %v1228_v23 = vadd.f32 %v1227_v21, %v1226_v15  ;;  %v674_v28 = vmax.f32 %v572_v18, 0.0  ;;  %v690_v29 = vmax.f32 %v636_v19, 0.0 }
 0x114   : > { %v1181_v24 = vpop.f32.mrf.mxu0  ;;  %v1229_v25 = vpop.f32.mrf.mxu1 }
 0x115   : > { %v575_v26 = vadd.f32 %v1180_v22, %v1462_v52  ;;  %v639_v27 = vadd.f32 %v1228_v23, %v1462_v52 }
 0x116   : > { %v1182_v30 = vpop.f32.mrf.mxu0  ;;  %v1230_v31 = vpop.f32.mrf.mxu1 }
 0x117   : > { %v675_v32 = vmax.f32 %v575_v26, 0.0  ;;  %v691_v33 = vmax.f32 %v639_v27, 0.0  ;;  %v1183_v34 = vadd.f32 %v1182_v30, %v1181_v24  ;;  %v1231_v35 = vadd.f32 %v1230_v31, %v1229_v25 }
 0x118   : > { %v1184_v36 = vpop.f32.mrf.mxu0  ;;  %v1232_v37 = vpop.f32.mrf.mxu1 }
 0x119   : > { %v1063_v38 = vpack.c.bf16 %v675_v32, %v674_v28  ;;  %v1103_v39 = vpack.c.bf16 %v691_v33, %v690_v29  ;;  %v580_v40 = vadd.f32 %v1183_v34, %v1462_v52  ;;  %v644_v41 = vadd.f32 %v1231_v35, %v1462_v52 }
 0x11a   : > { %v1185_v42 = vpop.f32.mrf.mxu0  ;;  %v1233_v43 = vpop.f32.mrf.mxu1 }
 0x11b   : > { %1123 = vst [vmem:[%s1472_s4 + $0x20] sm:$0xff] %v1063_v38   ;;  %1131 = vst [vmem:[%s1472_s4 + $0x60] sm:$0xff] %v1103_v39   ;;  %v1186_v44 = vadd.f32 %v1185_v42, %v1184_v36  ;;  %v1234_v45 = vadd.f32 %v1233_v43, %v1232_v37  ;;  %v676_v50 = vmax.f32 %v580_v40, 0.0  ;;  %v692_v51 = vmax.f32 %v644_v41, 0.0 }
 0x11c   : > { %v1187_v46 = vpop.f32.mrf.mxu0  ;;  %v1235_v47 = vpop.f32.mrf.mxu1 }
 0x11d   : > { %v583_v48 = vadd.f32 %v1186_v44, %v1462_v52  ;;  %v647_v49 = vadd.f32 %v1234_v45, %v1462_v52 }
 0x11e   : > { %v1188_v53 = vpop.f32.mrf.mxu0  ;;  %v1236_v54 = vpop.f32.mrf.mxu1 }
 0x11f   : > { %v677_v55 = vmax.f32 %v583_v48, 0.0  ;;  %v693_v56 = vmax.f32 %v647_v49, 0.0  ;;  %v1189_v57 = vadd.f32 %v1188_v53, %v1187_v46  ;;  %v1237_v58 = vadd.f32 %v1236_v54, %v1235_v47 }
 0x120   : > { %v1190_v59 = vpop.f32.mrf.mxu0  ;;  %v1238_v60 = vpop.f32.mrf.mxu1 }
 0x121   : > { %v1068_v61 = vpack.c.bf16 %v677_v55, %v676_v50  ;;  %v1108_v62 = vpack.c.bf16 %v693_v56, %v692_v51  ;;  %v588_v63 = vadd.f32 %v1189_v57, %v1462_v52  ;;  %v652_v0 = vadd.f32 %v1237_v58, %v1462_v52 }
 0x122   : > { %v1191_v1 = vpop.f32.mrf.mxu0  ;;  %v1239_v2 = vpop.f32.mrf.mxu1 }
 0x123   : > { %1124 = vst [vmem:[%s1472_s4 + $0x28] sm:$0xff] %v1068_v61   ;;  %1132 = vst [vmem:[%s1472_s4 + $0x68] sm:$0xff] %v1108_v62   ;;  %v1192_v3 = vadd.f32 %v1191_v1, %v1190_v59  ;;  %v1240_v4 = vadd.f32 %v1239_v2, %v1238_v60  ;;  %v678_v9 = vmax.f32 %v588_v63, 0.0  ;;  %v694_v10 = vmax.f32 %v652_v0, 0.0 }
 0x124   : > { %v1193_v5 = vpop.f32.mrf.mxu0  ;;  %v1241_v6 = vpop.f32.mrf.mxu1 }
 0x125   : > { %v591_v7 = vadd.f32 %v1192_v3, %v1462_v52  ;;  %v655_v8 = vadd.f32 %v1240_v4, %v1462_v52 }
 0x126   : > { %v1194_v11 = vpop.f32.mrf.mxu0  ;;  %v1242_v12 = vpop.f32.mrf.mxu1 }
 0x127   : > { %v679_v13 = vmax.f32 %v591_v7, 0.0  ;;  %v695_v14 = vmax.f32 %v655_v8, 0.0  ;;  %v1195_v15 = vadd.f32 %v1194_v11, %v1193_v5  ;;  %v1243_v16 = vadd.f32 %v1242_v12, %v1241_v6 }
 0x128   : > { %v1196_v17 = vpop.f32.mrf.mxu0  ;;  %v1244_v18 = vpop.f32.mrf.mxu1 }
 0x129   : > { %v1073_v19 = vpack.c.bf16 %v679_v13, %v678_v9  ;;  %v1113_v20 = vpack.c.bf16 %v695_v14, %v694_v10  ;;  %v596_v23 = vadd.f32 %v1195_v15, %v1462_v52  ;;  %v660_v24 = vadd.f32 %v1243_v16, %v1462_v52 }
 0x12a   : > { %v1197_v21 = vpop.f32.mrf.mxu0  ;;  %v1245_v22 = vpop.f32.mrf.mxu1 }
 0x12b   : > { %1125 = vst [vmem:[%s1472_s4 + $0x30] sm:$0xff] %v1073_v19   ;;  %1133 = vst [vmem:[%s1472_s4 + $0x70] sm:$0xff] %v1113_v20   ;;  %v1198_v25 = vadd.f32 %v1197_v21, %v1196_v17  ;;  %v1246_v26 = vadd.f32 %v1245_v22, %v1244_v18  ;;  %v680_v29 = vmax.f32 %v596_v23, 0.0  ;;  %v696_v30 = vmax.f32 %v660_v24, 0.0 }
 0x12d   : > { %v599_v27 = vadd.f32 %v1198_v25, %v1462_v52  ;;  %v663_v28 = vadd.f32 %v1246_v26, %v1462_v52 }
 0x12f   : > { %v681_v31 = vmax.f32 %v599_v27, 0.0  ;;  %v697_v32 = vmax.f32 %v663_v28, 0.0 }
 0x131   : > { %v1078_v33 = vpack.c.bf16 %v681_v31, %v680_v29  ;;  %v1118_v34 = vpack.c.bf16 %v697_v32, %v696_v30 }
 0x133   : > { %1126 = vst [vmem:[%s1472_s4 + $0x38] sm:$0xff] %v1078_v33   ;;  %1134 = vst [vmem:[%s1472_s4 + $0x78] sm:$0xff] %v1118_v34  }
 0x134 PF: > { %s13_s12 = sadd.s32 1, %s1341_s12  }
 0x135   : > { %p10_p4 = scmp.ge.s32.totalorder %s13_s12, 10  }
 0x137   :  { %12 = sbr.rel (!%p10_p4) target bundleno = 1 (0x1), region = 62 }

// kernel: cvae_forward.4
= control target key start
LH: loop header
LB: loop body
LE: loop exit
PB: predicated region body
PF: predicated region fallthrough
CT: control target
= control target key end

     0   :  { %s2540_s12 = smov 0   ;;  %s3046_s0 = inlined_call_operand.vmem [shape: bf16[512,640], index: 0, kind: input, shape index: {}]   ;;  %s3047_s1 = inlined_call_operand.vmem [shape: bf16[640,128], index: 1, kind: input, shape index: {}]   ;;  %s3048_s2 = inlined_call_operand.vmem [shape: f32[1,128], index: 2, kind: input, shape index: {}]   ;;  %s3049_s3 = inlined_call_operand.vmem [shape: bf16[512,128], index: 3, kind: output, shape index: {}]  }
   0x1 LB: > { %s1748_s13 = sadd.s32 4294967295, %s2518_s12   ;;  %p1752_p0 = scmp.ge.s32.totalorder %s2518_s12, 1  ;;  %s2518_s12 = sphi %s2540_s12, %s13_s12  }
   0x2   : > { %p139_p1 = scmp.lt.s32.totalorder %s2518_s12, 3 }
   0x4   : > { %p140_p2 = pnand %p1752_p0, %p139_p1 }
   0x6   : > { %143 = sbr.rel (%p140_p2) target bundleno = 406 (0x196), region = 32 }
   0xb   : > { %v2360_v0 = vld [vmem:[%s3047_s1 + $0x78] sm:$0xff]   ;;  %s1753_s16 = sshll.u32 %s1748_s13, 5  ;;  %v2362_v2 = vld [vmem:[%s3047_s1 + $0x70] sm:$0xff]   ;;  %v2364_v4 = vld [vmem:[%s3047_s1 + $0x68] sm:$0xff]  }
   0xc   : > { %v2361_v1 = vld [vmem:[%s3047_s1 + $0x38] sm:$0xff]   ;;  %2039 = vmatprep.subr.bf16.mxu0 %v2360_v0  ;;  %2335 = vmatprep.subr.bf16.mxu1 %v2360_v0  ;;  %p165_p3 = scmp.lt.s32.totalorder %s1753_s16, 63  ;;  %v2363_v3 = vld [vmem:[%s3047_s1 + $0x30] sm:$0xff]   ;;  %v2365_v5 = vld [vmem:[%s3047_s1 + $0x28] sm:$0xff]  }
   0xd   : > { %2040 = vmatpush3.bf16.msra.mxu0 %v2361_v1  ;;  %2343 = vmatpush3.bf16.msra.mxu1 %v2361_v1  ;;  %v2366_v6 = vld [vmem:[%s3047_s1 + $0x60] sm:$0xff]   ;;  %v2368_v8 = vld [vmem:[%s3047_s1 + $0x58] sm:$0xff]   ;;  %v2370_v10 = vld [vmem:[%s3047_s1 + $0x50] sm:$0xff]  }
   0xe   : > { %2041 = vmatprep.subr.bf16.mxu0 %v2362_v2  ;;  %2336 = vmatprep.subr.bf16.mxu1 %v2362_v2  ;;  %s3095_s16 = smov (!%p165_p3, %s1753_s16), 63  ;;  %v2367_v7 = vld [vmem:[%s3047_s1 + $0x20] sm:$0xff]   ;;  %v2369_v9 = vld [vmem:[%s3047_s1 + $0x18] sm:$0xff]   ;;  %v2371_v13 = vld [vmem:[%s3047_s1 + $0x10] sm:$0xff]  }
   0xf   : > { %s2351_s29 = smul.u32 20, %s3095_s16  ;;  %v2372_v14 = vld [vmem:[%s3047_s1 + $0x48] sm:$0xff]   ;;  %v2374_v16 = vld [vmem:[%s3047_s1 + $0x40] sm:$0xff]   ;;  %v2382_v18 = vld [vmem:[%s3047_s1 + $0xf8] sm:$0xff]   ;;  %s1756_s27 = sshll.u32 %s3095_s16, 2 }
  0x10   : > { %v2373_v15 = vld [vmem:[%s3047_s1 + $0x8] sm:$0xff]   ;;  %v2375_v17 = vld [vmem:[%s3047_s1] sm:$0xff]   ;;  %v2385_v19 = vld [vmem:[%s3047_s1 + $0x138] sm:$0xff]  }
  0x11   : > { %2042 = vmatpush3.bf16.msra.mxu0 %v2363_v3  ;;  %2344 = vmatpush3.bf16.msra.mxu1 %v2363_v3  ;;  %s2581_s9 = scalar_lea.vmem %s3046_s0, %s2351_s29  ;;  %v2383_v22 = vld [vmem:[%s3047_s1 + $0xb8] sm:$0xff]   ;;  %v2384_v23 = vld [vmem:[%s3047_s1 + $0xf0] sm:$0xff]   ;;  %v2393_v29 = vld [vmem:[%s3047_s1 + $0xe8] sm:$0xff]   ;;  %s2921_s29 = scalar_lea.vmem %s3049_s3, %s1756_s27 }
  0x12   : > { %2043 = vmatprep.subr.bf16.mxu0 %v2364_v4  ;;  %2337 = vmatprep.subr.bf16.mxu1 %v2364_v4  ;;  %v2378_v11 = vld [vmem:[%s2581_s9 + $0x4] ss:$20 sps:$4 sm:$0xff]   ;;  %v2376_v20 = vld [vmem:[%s2581_s9] ss:$20 sps:$4 sm:$0xff]   ;;  %v2391_v28 = vld [vmem:[%s2581_s9 + $0x28] ss:$20 sps:$4 sm:$0xff]  }
  0x13   : > { %v2381_v12 = vld [vmem:[%s2581_s9 + $0x1e4] ss:$20 sps:$4 sm:$0xff]   ;;  %1049 = vmatprep.mubr.bf16.mxu0 %v2378_v11  ;;  %v2379_v21 = vld [vmem:[%s2581_s9 + $0x1e0] ss:$20 sps:$4 sm:$0xff]   ;;  %v2392_v30 = vld [vmem:[%s2581_s9 + $0x208] ss:$20 sps:$4 sm:$0xff]  }
  0x14   : > { %1145 = vmatprep.mubr.bf16.mxu1 %v2381_v12  ;;  %v2387_v24 = vld [vmem:[%s2581_s9 + $0x2c] ss:$20 sps:$4 sm:$0xff]   ;;  %v2404_v26 = vld [vmem:[%s3047_s1 + $0x130] sm:$0xff]   ;;  %v2403_v36 = vld [vmem:[%s3047_s1 + $0xd8] sm:$0xff]  }
  0x15   : > { %2044 = vmatpush3.bf16.msra.mxu0 %v2365_v5  ;;  %2345 = vmatpush3.bf16.msra.mxu1 %v2365_v5  ;;  %v2389_v25 = vld [vmem:[%s2581_s9 + $0x20c] ss:$20 sps:$4 sm:$0xff]   ;;  %v2386_v27 = vld [vmem:[%s3047_s1 + $0xb0] sm:$0xff]   ;;  %v2405_v40 = vld [vmem:[%s3047_s1 + $0x98] sm:$0xff]  }
  0x16   : > { %2045 = vmatprep.subr.bf16.mxu0 %v2366_v6  ;;  %2338 = vmatprep.subr.bf16.mxu1 %v2366_v6  ;;  %v2394_v31 = vld [vmem:[%s3047_s1 + $0xa8] sm:$0xff]   ;;  %v2395_v33 = vld [vmem:[%s3047_s1 + $0xe0] sm:$0xff]   ;;  %v2406_v41 = vld [vmem:[%s3047_s1 + $0xd0] sm:$0xff]  }
  0x17   : > { %v2397_v32 = vld [vmem:[%s2581_s9 + $0x54] ss:$20 sps:$4 sm:$0xff]   ;;  %v2396_v35 = vld [vmem:[%s3047_s1 + $0xa0] sm:$0xff]   ;;  %v2408_v42 = vld [vmem:[%s2581_s9 + $0x7c] ss:$20 sps:$4 sm:$0xff]  }
  0x18   : > { %v2399_v34 = vld [vmem:[%s2581_s9 + $0x234] ss:$20 sps:$4 sm:$0xff]   ;;  %v2401_v37 = vld [vmem:[%s2581_s9 + $0x50] ss:$20 sps:$4 sm:$0xff]   ;;  %v2412_v46 = vld [vmem:[%s2581_s9 + $0x78] ss:$20 sps:$4 sm:$0xff]  }
  0x19   : > { %2046 = vmatpush3.bf16.msra.mxu0 %v2367_v7  ;;  %2346 = vmatpush3.bf16.msra.mxu1 %v2367_v7  ;;  %v2417_v38 = vld [vmem:[%s3047_s1 + $0x128] sm:$0xff]   ;;  %v2402_v39 = vld [vmem:[%s2581_s9 + $0x230] ss:$20 sps:$4 sm:$0xff]   ;;  %v2438_v52 = vld [vmem:[%s3047_s1 + $0x118] sm:$0xff]  }
  0x1a   : > { %2047 = vmatprep.subr.bf16.mxu0 %v2368_v8  ;;  %2339 = vmatprep.subr.bf16.mxu1 %v2368_v8  ;;  %v2410_v43 = vld [vmem:[%s2581_s9 + $0x25c] ss:$20 sps:$4 sm:$0xff]   ;;  %v2431_v45 = vld [vmem:[%s3047_s1 + $0x120] sm:$0xff]   ;;  %v2413_v47 = vld [vmem:[%s2581_s9 + $0x258] ss:$20 sps:$4 sm:$0xff]  }
  0x1b   : > { %v2407_v44 = vld [vmem:[%s3047_s1 + $0x90] sm:$0xff]   ;;  %v2414_v48 = vld [vmem:[%s3047_s1 + $0xc8] sm:$0xff]   ;;  %v2416_v50 = vld [vmem:[%s3047_s1 + $0xc0] sm:$0xff]  }
  0x1c   : > { %v2415_v49 = vld [vmem:[%s3047_s1 + $0x88] sm:$0xff]   ;;  %v2419_v51 = vld [vmem:[%s2581_s9 + $0xa4] ss:$20 sps:$4 sm:$0xff]   ;;  %v2424_v56 = vld [vmem:[%s2581_s9 + $0xa0] ss:$20 sps:$4 sm:$0xff]  }
  0x1d   : > { %2048 = vmatpush3.bf16.msra.mxu0 %v2369_v9  ;;  %2347 = vmatpush3.bf16.msra.mxu1 %v2369_v9  ;;  %v2423_v53 = vld [vmem:[%s2581_s9 + $0xc] ss:$20 sps:$4 sm:$0xff]   ;;  %v2421_v55 = vld [vmem:[%s2581_s9 + $0x8] ss:$20 sps:$4 sm:$0xff]   ;;  %v2451_v57 = vld [vmem:[%s3047_s1 + $0x110] sm:$0xff]  }
  0x1e   : > { %2049 = vmatprep.subr.bf16.mxu0 %v2370_v10  ;;  %2340 = vmatprep.subr.bf16.mxu1 %v2370_v10  ;;  %v2418_v54 = vld [vmem:[%s3047_s1 + $0x80] sm:$0xff]   ;;  %v2427_v59 = vld [vmem:[%s2581_s9 + $0x34] ss:$20 sps:$4 sm:$0xff]   ;;  %v2434_v0 = vld [vmem:[%s2581_s9 + $0x5c] ss:$20 sps:$4 sm:$0xff]  }
  0x1f   : > { %v2425_v58 = vld [vmem:[%s2581_s9 + $0xcc] ss:$20 sps:$4 sm:$0xff]   ;;  %v2429_v61 = vld [vmem:[%s2581_s9 + $0xc8] ss:$20 sps:$4 sm:$0xff]   ;;  %v2430_v62 = vld [vmem:[%s2581_s9 + $0x30] ss:$20 sps:$4 sm:$0xff]  }
  0x20   : > { %v2458_v60 = vld [vmem:[%s3047_s1 + $0x108] sm:$0xff]   ;;  %v2471_v1 = vld [vmem:[%s3047_s1 + $0x100] sm:$0xff]   ;;  %v2439_v4 = vld [vmem:[%s2581_s9 + $0x11c] ss:$20 sps:$4 sm:$0xff]  }
  0x21   : > { %2050 = vmatpush3.bf16.msra.mxu0 %v2371_v13  ;;  %2348 = vmatpush3.bf16.msra.mxu1 %v2371_v13  ;;  %v2432_v63 = vld [vmem:[%s2581_s9 + $0xf4] ss:$20 sps:$4 sm:$0xff]   ;;  %v2436_v2 = vld [vmem:[%s2581_s9 + $0xf0] ss:$20 sps:$4 sm:$0xff]   ;;  %v2437_v3 = vld [vmem:[%s2581_s9 + $0x58] ss:$20 sps:$4 sm:$0xff]  }
  0x22   : > { %2051 = vmatprep.subr.bf16.mxu0 %v2372_v14  ;;  %2341 = vmatprep.subr.bf16.mxu1 %v2372_v14  ;;  %v2441_v5 = vld [vmem:[%s2581_s9 + $0x84] ss:$20 sps:$4 sm:$0xff]   ;;  %v2444_v7 = vld [vmem:[%s2581_s9 + $0x80] ss:$20 sps:$4 sm:$0xff]   ;;  %v2450_v11 = vld [vmem:[%s2581_s9 + $0xa8] ss:$20 sps:$4 sm:$0xff]  }
  0x23   : > { %v2443_v6 = vld [vmem:[%s2581_s9 + $0x118] ss:$20 sps:$4 sm:$0xff]   ;;  %v2449_v10 = vld [vmem:[%s2581_s9 + $0x140] ss:$20 sps:$4 sm:$0xff]   ;;  %v2456_v14 = vld [vmem:[%s2581_s9 + $0x168] ss:$20 sps:$4 sm:$0xff]  }
  0x24   : > { %v2445_v8 = vld [vmem:[%s2581_s9 + $0x144] ss:$20 sps:$4 sm:$0xff]   ;;  %v2447_v9 = vld [vmem:[%s2581_s9 + $0xac] ss:$20 sps:$4 sm:$0xff]   ;;  %v2454_v13 = vld [vmem:[%s2581_s9 + $0xd4] ss:$20 sps:$4 sm:$0xff]  }
  0x25   : > { %2052 = vmatpush3.bf16.msra.mxu0 %v2373_v15  ;;  %2349 = vmatpush3.bf16.msra.mxu1 %v2373_v15  ;;  %v2452_v12 = vld [vmem:[%s2581_s9 + $0x16c] ss:$20 sps:$4 sm:$0xff]   ;;  %v2457_v15 = vld [vmem:[%s2581_s9 + $0xd0] ss:$20 sps:$4 sm:$0xff]  }
  0x26   : > { %2053 = vmatprep.subr.bf16.mxu0 %v2374_v16  ;;  %2342 = vmatprep.subr.bf16.mxu1 %v2374_v16  ;;  %v2459_v16 = vld [vmem:[%s2581_s9 + $0x194] ss:$20 sps:$4 sm:$0xff]  }
  0x29   : > { %2054 = vmatpush3.bf16.msra.mxu0 %v2375_v17  ;;  %2350 = vmatpush3.bf16.msra.mxu1 %v2375_v17  ;;  %v2461_v17 = vld [vmem:[%s2581_s9 + $0xfc] ss:$20 sps:$4 sm:$0xff]  }
  0x2a   : > { %2151 = vmatprep.subr.bf16.mxu1 %v2382_v18  ;;  %2287 = vmatprep.subr.bf16.mxu0 %v2385_v19  ;;  %v2463_v18 = vld [vmem:[%s2581_s9 + $0x190] ss:$20 sps:$4 sm:$0xff]  }
  0x2c   : > { %1050 = vmatmul.mubr.bf16.vlgmr.msra.gmra.mxu0 %v2376_v20  ;;  %1146 = vmatmul.mubr.bf16.vlgmr.msra.gmra.mxu1 %v2379_v21  ;;  %v2465_v20 = vld [vmem:[%s2581_s9 + $0x1bc] ss:$20 sps:$4 sm:$0xff]   ;;  %v2467_v21 = vld [vmem:[%s2581_s9 + $0x124] ss:$20 sps:$4 sm:$0xff]  }
  0x2d   : > { %2152 = vmatpush3.bf16.msra.mxu1 %v2383_v22  ;;  %2288 = vmatpush3.bf16.msra.mxu0 %v2385_v19  ;;  %v2464_v19 = vld [vmem:[%s2581_s9 + $0xf8] ss:$20 sps:$4 sm:$0xff]  }
  0x2e   : > { %2153 = vmatprep.subr.bf16.mxu1 %v2384_v23  ;;  %1057 = vmatprep.mubr.bf16.mxu0 %v2387_v24  ;;  %v2469_v22 = vld [vmem:[%s2581_s9 + $0x1b8] ss:$20 sps:$4 sm:$0xff]   ;;  %v2470_v23 = vld [vmem:[%s2581_s9 + $0x120] ss:$20 sps:$4 sm:$0xff]  }
  0x2f   : > { %1153 = vmatprep.mubr.bf16.mxu1 %v2389_v25  ;;  %2289 = vmatprep.subr.bf16.mxu0 %v2404_v26  ;;  %v2472_v24 = vld [vmem:[%s2581_s9 + $0x14c] ss:$20 sps:$4 sm:$0xff]   ;;  %v2474_v25 = vld [vmem:[%s2581_s9 + $0x10] ss:$20 sps:$4 sm:$0xff]  }
  0x31   : > { %2154 = vmatpush3.bf16.msra.mxu1 %v2386_v27  ;;  %2290 = vmatpush3.bf16.msra.mxu0 %v2404_v26  ;;  %v2475_v26 = vld [vmem:[%s2581_s9 + $0x148] ss:$20 sps:$4 sm:$0xff]   ;;  %v2476_v27 = vld [vmem:[%s2581_s9 + $0x38] ss:$20 sps:$4 sm:$0xff]  }
  0x32   : > { %2155 = vmatprep.subr.bf16.mxu1 %v2393_v29  ;;  %2291 = vmatprep.subr.bf16.mxu0 %v2417_v38  ;;  %v2479_v29 = vld [vmem:[%s2581_s9 + $0x60] ss:$20 sps:$4 sm:$0xff]  }
  0x34   : > { %1058 = vmatmul.mubr.bf16.gmra.mxu0 %v2391_v28  ;;  %1154 = vmatmul.mubr.bf16.gmra.mxu1 %v2392_v30  ;;  %v2477_v28 = vld [vmem:[%s2581_s9 + $0x174] ss:$20 sps:$4 sm:$0xff]   ;;  %v2480_v30 = vld [vmem:[%s2581_s9 + $0x170] ss:$20 sps:$4 sm:$0xff]  }
  0x35   : > { %2156 = vmatpush3.bf16.msra.mxu1 %v2394_v31  ;;  %1065 = vmatprep.mubr.bf16.mxu0 %v2397_v32  ;;  %v2481_v31 = vld [vmem:[%s2581_s9 + $0x88] ss:$20 sps:$4 sm:$0xff]  }
  0x36   : > { %2157 = vmatprep.subr.bf16.mxu1 %v2395_v33  ;;  %1161 = vmatprep.mubr.bf16.mxu1 %v2399_v34  ;;  %v2482_v32 = vld [vmem:[%s2581_s9 + $0x19c] ss:$20 sps:$4 sm:$0xff]   ;;  %v2485_v34 = vld [vmem:[%s2581_s9 + $0x198] ss:$20 sps:$4 sm:$0xff]  }
  0x37   : > { %2292 = vmatpush3.bf16.msra.mxu0 %v2417_v38  ;;  %v2484_v33 = vld [vmem:[%s2581_s9 + $0xb0] ss:$20 sps:$4 sm:$0xff]   ;;  %v2490_v38 = vld [vmem:[%s2581_s9 + $0x1c0] ss:$20 sps:$4 sm:$0xff]  }
  0x38   : > { %2293 = vmatprep.subr.bf16.mxu0 %v2431_v45 }
  0x39   : > { %2158 = vmatpush3.bf16.msra.mxu1 %v2396_v35  ;;  %v2486_v35 = vld [vmem:[%s2581_s9 + $0xd8] ss:$20 sps:$4 sm:$0xff]  }
  0x3a   : > { %2159 = vmatprep.subr.bf16.mxu1 %v2403_v36  ;;  %v2487_v36 = vld [vmem:[%s2581_s9 + $0x1c4] ss:$20 sps:$4 sm:$0xff]  }
  0x3b   : > { %2294 = vmatpush3.bf16.msra.mxu0 %v2431_v45  ;;  %v2499_v45 = vld [vmem:[%s2581_s9 + $0x1a0] ss:$20 sps:$4 sm:$0xff]  }
  0x3c   : > { %1066 = vmatmul.mubr.bf16.gmra.mxu0 %v2401_v37  ;;  %1162 = vmatmul.mubr.bf16.gmra.mxu1 %v2402_v39  ;;  %v2489_v37 = vld [vmem:[%s2581_s9 + $0x100] ss:$20 sps:$4 sm:$0xff]   ;;  %v2491_v39 = vld [vmem:[%s2581_s9 + $0x128] ss:$20 sps:$4 sm:$0xff]  }
  0x3d   : > { %2160 = vmatpush3.bf16.msra.mxu1 %v2405_v40  ;;  %1073 = vmatprep.mubr.bf16.mxu0 %v2408_v42  ;;  %v2492_v40 = vld [vmem:[%s2581_s9 + $0x1ec] ss:$20 sps:$4 sm:$0xff]   ;;  %v2495_v42 = vld [vmem:[%s2581_s9 + $0x1e8] ss:$20 sps:$4 sm:$0xff]  }
  0x3e   : > { %2161 = vmatprep.subr.bf16.mxu1 %v2406_v41  ;;  %1169 = vmatprep.mubr.bf16.mxu1 %v2410_v43  ;;  %v2494_v41 = vld [vmem:[%s2581_s9 + $0x150] ss:$20 sps:$4 sm:$0xff]   ;;  %v2496_v43 = vld [vmem:[%s2581_s9 + $0x178] ss:$20 sps:$4 sm:$0xff]  }
  0x3f   : > { %2295 = vmatprep.subr.bf16.mxu0 %v2438_v52 }
  0x40   : > { %2296 = vmatpush3.bf16.msra.mxu0 %v2438_v52  ;;  %v2507_v52 = vld [vmem:[%s2581_s9 + $0x264] ss:$20 sps:$4 sm:$0xff]  }
  0x41   : > { %2162 = vmatpush3.bf16.msra.mxu1 %v2407_v44  ;;  %2297 = vmatprep.subr.bf16.mxu0 %v2451_v57  ;;  %v2497_v44 = vld [vmem:[%s2581_s9 + $0x214] ss:$20 sps:$4 sm:$0xff]  }
  0x42   : > { %2163 = vmatprep.subr.bf16.mxu1 %v2414_v48  ;;  %v2502_v48 = vld [vmem:[%s2581_s9 + $0x23c] ss:$20 sps:$4 sm:$0xff]  }
  0x44   : > { %1074 = vmatmul.mubr.bf16.gmra.mxu0 %v2412_v46  ;;  %1170 = vmatmul.mubr.bf16.gmra.mxu1 %v2413_v47  ;;  %v2500_v46 = vld [vmem:[%s2581_s9 + $0x210] ss:$20 sps:$4 sm:$0xff]   ;;  %v2501_v47 = vld [vmem:[%s2581_s9 + $0x1c8] ss:$20 sps:$4 sm:$0xff]  }
  0x45   : > { %2164 = vmatpush3.bf16.msra.mxu1 %v2415_v49  ;;  %1081 = vmatprep.mubr.bf16.mxu0 %v2419_v51  ;;  %v2504_v49 = vld [vmem:[%s2581_s9 + $0x1f0] ss:$20 sps:$4 sm:$0xff]   ;;  %v2506_v51 = vld [vmem:[%s2581_s9 + $0x218] ss:$20 sps:$4 sm:$0xff]  }
  0x46   : > { %2165 = vmatprep.subr.bf16.mxu1 %v2416_v50  ;;  %1210 = vmatprep.mubr.bf16.mxu1 %v2423_v53  ;;  %v2505_v50 = vld [vmem:[%s2581_s9 + $0x238] ss:$20 sps:$4 sm:$0xff]   ;;  %v2509_v53 = vld [vmem:[%s2581_s9 + $0x240] ss:$20 sps:$4 sm:$0xff]  }
  0x47   : > { %2298 = vmatpush3.bf16.msra.mxu0 %v2451_v57 }
  0x48   : > { %2299 = vmatprep.subr.bf16.mxu0 %v2458_v60 }
  0x49   : > { %2166 = vmatpush3.bf16.msra.mxu1 %v2418_v54  ;;  %v2510_v54 = vld [vmem:[%s2581_s9 + $0x260] ss:$20 sps:$4 sm:$0xff]  }
  0x4b   : > { %2300 = vmatpush3.bf16.msra.mxu0 %v2458_v60 }
  0x4c   : > { %1082 = vmatmul.mubr.bf16.gmra.mxu0 %v2424_v56  ;;  %1211 = vmatmul.mubr.bf16.vlgmr.msra.gmra.mxu1 %v2421_v55  ;;  %v2511_v55 = vld [vmem:[%s2581_s9 + $0x268] ss:$20 sps:$4 sm:$0xff]  }
  0x4d   : > { %1089 = vmatprep.mubr.bf16.mxu0 %v2425_v58  ;;  %1218 = vmatprep.mubr.bf16.mxu1 %v2427_v59 }
  0x4e   : > { %2301 = vmatprep.subr.bf16.mxu0 %v2471_v1 }
  0x4f   : > { %2302 = vmatpush3.bf16.msra.mxu0 %v2471_v1 }
  0x54   : > { %1090 = vmatmul.mubr.bf16.gmra.mxu0 %v2429_v61  ;;  %1219 = vmatmul.mubr.bf16.gmra.mxu1 %v2430_v62 }
  0x55   : > { %1097 = vmatprep.mubr.bf16.mxu0 %v2432_v63  ;;  %1226 = vmatprep.mubr.bf16.mxu1 %v2434_v0 }
  0x5c   : > { %1098 = vmatmul.mubr.bf16.gmra.mxu0 %v2436_v2  ;;  %1227 = vmatmul.mubr.bf16.gmra.mxu1 %v2437_v3 }
  0x5d   : > { %1105 = vmatprep.mubr.bf16.mxu0 %v2439_v4  ;;  %1234 = vmatprep.mubr.bf16.mxu1 %v2441_v5 }
  0x64   : > { %1106 = vmatmul.mubr.bf16.gmra.mxu0 %v2443_v6  ;;  %1235 = vmatmul.mubr.bf16.gmra.mxu1 %v2444_v7 }
  0x65   : > { %1113 = vmatprep.mubr.bf16.mxu0 %v2445_v8  ;;  %1242 = vmatprep.mubr.bf16.mxu1 %v2447_v9 }
  0x6c   : > { %1114 = vmatmul.mubr.bf16.gmra.mxu0 %v2449_v10  ;;  %1243 = vmatmul.mubr.bf16.gmra.mxu1 %v2450_v11 }
  0x6d   : > { %1121 = vmatprep.mubr.bf16.mxu0 %v2452_v12  ;;  %1250 = vmatprep.mubr.bf16.mxu1 %v2454_v13 }
  0x74   : > { %1122 = vmatmul.mubr.bf16.gmra.mxu0 %v2456_v14  ;;  %1251 = vmatmul.mubr.bf16.gmra.mxu1 %v2457_v15 }
  0x75   : > { %1129 = vmatprep.mubr.bf16.mxu0 %v2459_v16  ;;  %1258 = vmatprep.mubr.bf16.mxu1 %v2461_v17 }
  0x7c   : > { %1130 = vmatmul.mubr.bf16.gmra.mxu0 %v2463_v18  ;;  %1259 = vmatmul.mubr.bf16.gmra.mxu1 %v2464_v19 }
  0x7d   : > { %1137 = vmatprep.mubr.bf16.mxu0 %v2465_v20  ;;  %1266 = vmatprep.mubr.bf16.mxu1 %v2467_v21 }
  0x84   : > { %1138 = vmatmul.mubr.bf16.gmra.mxu0 %v2469_v22  ;;  %1267 = vmatmul.mubr.bf16.gmra.mxu1 %v2470_v23 }
  0x85   : > { %1274 = vmatprep.mubr.bf16.mxu1 %v2472_v24  ;;  %2303 = vmatprep.mubr.bf16.mxu0 %v2474_v25 }
  0x8c   : > { %1275 = vmatmul.mubr.bf16.gmra.mxu1 %v2475_v26  ;;  %2304 = vmatmul.mubr.bf16.vlgmr.msra.gmra.mxu0 %v2476_v27 }
  0x8d   : > { %1282 = vmatprep.mubr.bf16.mxu1 %v2477_v28  ;;  %2307 = vmatprep.mubr.bf16.mxu0 %v2479_v29 }
  0x94   : > { %1283 = vmatmul.mubr.bf16.gmra.mxu1 %v2480_v30  ;;  %2308 = vmatmul.mubr.bf16.gmra.mxu0 %v2481_v31 }
  0x95   : > { %1290 = vmatprep.mubr.bf16.mxu1 %v2482_v32  ;;  %2311 = vmatprep.mubr.bf16.mxu0 %v2484_v33 }
  0x9c   : > { %1291 = vmatmul.mubr.bf16.gmra.mxu1 %v2485_v34  ;;  %2312 = vmatmul.mubr.bf16.gmra.mxu0 %v2486_v35 }
  0x9d   : > { %1298 = vmatprep.mubr.bf16.mxu1 %v2487_v36  ;;  %2315 = vmatprep.mubr.bf16.mxu0 %v2489_v37 }
  0xa4   : > { %1299 = vmatmul.mubr.bf16.gmra.mxu1 %v2490_v38  ;;  %2316 = vmatmul.mubr.bf16.gmra.mxu0 %v2491_v39 }
  0xa5   : > { %1306 = vmatprep.mubr.bf16.mxu1 %v2492_v40  ;;  %2319 = vmatprep.mubr.bf16.mxu0 %v2494_v41 }
  0xac   : > { %1307 = vmatmul.mubr.bf16.gmra.mxu1 %v2495_v42  ;;  %2320 = vmatmul.mubr.bf16.gmra.mxu0 %v2496_v43  ;;  %v2789_v42 = vld [vmem:[%s3048_s2] ss:$0 sm:$0xff] }
  0xad   : > { %1314 = vmatprep.mubr.bf16.mxu1 %v2497_v44  ;;  %2323 = vmatprep.mubr.bf16.mxu0 %v2499_v45 }
  0xb4   : > { %1315 = vmatmul.mubr.bf16.gmra.mxu1 %v2500_v46  ;;  %2324 = vmatmul.mubr.bf16.gmra.mxu0 %v2501_v47 }
  0xb5   : > { %1322 = vmatprep.mubr.bf16.mxu1 %v2502_v48  ;;  %2327 = vmatprep.mubr.bf16.mxu0 %v2504_v49 }
  0xbc   : > { %1323 = vmatmul.mubr.bf16.gmra.mxu1 %v2505_v50  ;;  %2328 = vmatmul.mubr.bf16.gmra.mxu0 %v2506_v51 }
  0xbd   : > { %1330 = vmatprep.mubr.bf16.mxu1 %v2507_v52  ;;  %2331 = vmatprep.mubr.bf16.mxu0 %v2509_v53 }
  0xc4   : > { %1331 = vmatmul.mubr.bf16.gmra.mxu1 %v2510_v54  ;;  %2332 = vmatmul.mubr.bf16.gmra.mxu0 %v2511_v55 }
  0xec   : > { %v2055_v56 = vpop.f32.mrf.mxu0  ;;  %v2127_v57 = vpop.f32.mrf.mxu1 }
  0xee   : > { %v2056_v58 = vpop.f32.mrf.mxu0  ;;  %v2128_v59 = vpop.f32.mrf.mxu1 }
  0xef   : > { %v2057_v60 = vadd.f32 %v2056_v58, %v2055_v56  ;;  %v2756_v61 = vadd.f32 %v2128_v59, %v2127_v57 }
  0xf0   : > { %v2058_v62 = vpop.f32.mrf.mxu0  ;;  %v2130_v63 = vpop.f32.mrf.mxu1 }
  0xf1   : > { %3050 = vst [vmem:[#allocation2_spill] sm:$0xff] %v2756_v61  ;;  %v1052_v45 = vadd.f32 %v2057_v60, %v2789_v42 }
  0xf2   : > { %v2059_v0 = vpop.f32.mrf.mxu0  ;;  %v2131_v1 = vpop.f32.mrf.mxu1 }
  0xf3   : > { %v2758_v2 = vadd.f32 %v2059_v0, %v2058_v62  ;;  %v2760_v3 = vadd.f32 %v2131_v1, %v2130_v63 }
  0xf4   : > { %v2061_v4 = vpop.f32.mrf.mxu0  ;;  %v2133_v5 = vpop.f32.mrf.mxu1 }
  0xf5   : > { %3051 = vst [vmem:[#allocation3_spill] sm:$0xff] %v2760_v3 }
  0xf6   : > { %v2062_v6 = vpop.f32.mrf.mxu0  ;;  %v2134_v7 = vpop.f32.mrf.mxu1 }
  0xf7   : > { %v2762_v8 = vadd.f32 %v2062_v6, %v2061_v4  ;;  %v2764_v9 = vadd.f32 %v2134_v7, %v2133_v5 }
  0xf8   : > { %v2064_v10 = vpop.f32.mrf.mxu0  ;;  %v2136_v11 = vpop.f32.mrf.mxu1 }
  0xf9   : > { %3052 = vst [vmem:[#allocation4_spill] sm:$0xff] %v2764_v9 }
  0xfa   : > { %v2065_v12 = vpop.f32.mrf.mxu0  ;;  %v2137_v13 = vpop.f32.mrf.mxu1 }
  0xfb   : > { %v2766_v14 = vadd.f32 %v2065_v12, %v2064_v10  ;;  %v2768_v15 = vadd.f32 %v2137_v13, %v2136_v11 }
  0xfc   : > { %v2067_v16 = vpop.f32.mrf.mxu0  ;;  %v2139_v17 = vpop.f32.mrf.mxu1 }
  0xfd   : > { %3053 = vst [vmem:[#allocation5_spill] sm:$0xff] %v2768_v15 }
  0xfe   : > { %v2068_v18 = vpop.f32.mrf.mxu0  ;;  %v2140_v19 = vpop.f32.mrf.mxu1 }
  0xff   : > { %v2770_v20 = vadd.f32 %v2068_v18, %v2067_v16  ;;  %v2772_v21 = vadd.f32 %v2140_v19, %v2139_v17 }
 0x100   : > { %v2070_v22 = vpop.f32.mrf.mxu0  ;;  %v2142_v23 = vpop.f32.mrf.mxu1 }
 0x101   : > { %3054 = vst [vmem:[#allocation6_spill] sm:$0xff] %v2772_v21 }
 0x102   : > { %v2071_v24 = vpop.f32.mrf.mxu0  ;;  %v2143_v25 = vpop.f32.mrf.mxu1 }
 0x103   : > { %v2774_v26 = vadd.f32 %v2071_v24, %v2070_v22  ;;  %v2776_v27 = vadd.f32 %v2143_v25, %v2142_v23 }
 0x104   : > { %v2073_v28 = vpop.f32.mrf.mxu0  ;;  %v2145_v29 = vpop.f32.mrf.mxu1 }
 0x105   : > { %3055 = vst [vmem:[#allocation7_spill] sm:$0xff] %v2776_v27 }
 0x106   : > { %v2074_v30 = vpop.f32.mrf.mxu0  ;;  %v2146_v31 = vpop.f32.mrf.mxu1 }
 0x107   : > { %v2778_v32 = vadd.f32 %v2074_v30, %v2073_v28  ;;  %v2780_v33 = vadd.f32 %v2146_v31, %v2145_v29 }
 0x108   : > { %v2076_v34 = vpop.f32.mrf.mxu0  ;;  %v2148_v35 = vpop.f32.mrf.mxu1 }
 0x109   : > { %3056 = vst [vmem:[#allocation8_spill] sm:$0xff] %v2780_v33 }
 0x10a   : > { %v2077_v36 = vpop.f32.mrf.mxu0  ;;  %v2149_v37 = vpop.f32.mrf.mxu1 }
 0x10b   : > { %v2782_v38 = vadd.f32 %v2077_v36, %v2076_v34  ;;  %v2784_v39 = vadd.f32 %v2149_v37, %v2148_v35 }
 0x10c   : > { %v2079_v40 = vpop.f32.mrf.mxu0  ;;  %v2167_v41 = vpop.f32.mrf.mxu1 }
 0x10d   : > { %3057 = vst [vmem:[#allocation9_spill] sm:$0xff] %v2784_v39 }
 0x10e   : > { %v2080_v43 = vpop.f32.mrf.mxu0  ;;  %v2168_v44 = vpop.f32.mrf.mxu1 }
 0x10f   : > { %v2792_v46 = vadd.f32 %v2080_v43, %v2079_v40  ;;  %v2169_v47 = vadd.f32 %v2168_v44, %v2167_v41 }
 0x110   : > { %v2082_v48 = vpop.f32.mrf.mxu0  ;;  %v2794_v49 = vpop.f32.mrf.mxu1 }
 0x111   : > { %v2796_v50 = vadd.f32 %v2169_v47, %v1052_v45 }
 0x112   : > { %v2083_v51 = vpop.f32.mrf.mxu0  ;;  %v2798_v52 = vpop.f32.mrf.mxu1 }
 0x113   : > { %v2800_v53 = vadd.f32 %v2083_v51, %v2082_v48 }
 0x114   : > { %v2085_v54 = vpop.f32.mrf.mxu0  ;;  %v2173_v55 = vpop.f32.mrf.mxu1 }
 0x116   : > { %v2086_v56 = vpop.f32.mrf.mxu0  ;;  %v2174_v57 = vpop.f32.mrf.mxu1 }
 0x117   : > { %v2802_v58 = vadd.f32 %v2086_v56, %v2085_v54  ;;  %v2175_v9 = vadd.f32 %v2174_v57, %v2173_v55 }
 0x118   : > { %v2088_v59 = vpop.f32.mrf.mxu0  ;;  %v2176_v60 = vpop.f32.mrf.mxu1 }
 0x11a   : > { %v2089_v62 = vpop.f32.mrf.mxu0  ;;  %v2177_v63 = vpop.f32.mrf.mxu1 }
 0x11b   : > { %v2804_v0 = vadd.f32 %v2089_v62, %v2088_v59 }
 0x11c   : > { %v2091_v1 = vpop.f32.mrf.mxu0  ;;  %v2806_v4 = vpop.f32.mrf.mxu1 }
 0x11e   : > { %v2092_v5 = vpop.f32.mrf.mxu0  ;;  %v2808_v6 = vpop.f32.mrf.mxu1 }
 0x11f   : > { %v2810_v7 = vadd.f32 %v2092_v5, %v2091_v1 }
 0x120   : > { %v2094_v10 = vpop.f32.mrf.mxu0  ;;  %v2812_v11 = vpop.f32.mrf.mxu1 }
 0x122   : > { %v2095_v12 = vpop.f32.mrf.mxu0  ;;  %v2814_v13 = vpop.f32.mrf.mxu1 }
 0x123   : > { %v2816_v16 = vadd.f32 %v2095_v12, %v2094_v10 }
 0x124   : > { %v2818_v17 = vpop.f32.mrf.mxu0  ;;  %v2185_v18 = vpop.f32.mrf.mxu1 }
 0x126   : > { %v2820_v19 = vpop.f32.mrf.mxu0  ;;  %v2186_v22 = vpop.f32.mrf.mxu1 }
 0x128   : > { %v2822_v23 = vpop.f32.mrf.mxu0  ;;  %v2188_v24 = vpop.f32.mrf.mxu1 }
 0x12a   : > { %v2824_v25 = vpop.f32.mrf.mxu0  ;;  %v2189_v28 = vpop.f32.mrf.mxu1 }
 0x12c   : > { %v2826_v29 = vpop.f32.mrf.mxu0  ;;  %v2828_v30 = vpop.f32.mrf.mxu1 }
 0x12e   : > { %v2830_v31 = vpop.f32.mrf.mxu0  ;;  %v2832_v34 = vpop.f32.mrf.mxu1 }
 0x12f   : > { %3058 = vst [vmem:[#allocation10_spill] sm:$0xff] %v2830_v31 }
 0x130   : > { %v2834_v35 = vpop.f32.mrf.mxu0  ;;  %v2836_v36 = vpop.f32.mrf.mxu1 }
 0x131   : > { %3059 = vst [vmem:[#allocation11_spill] sm:$0xff] %v2834_v35 }
 0x132   : > { %v2838_v37 = vpop.f32.mrf.mxu0  ;;  %v2840_v40 = vpop.f32.mrf.mxu1 }
 0x133   : > { %3060 = vst [vmem:[#allocation12_spill] sm:$0xff] %v2838_v37 }
 0x134   : > { %v2842_v41 = vpop.f32.mrf.mxu0  ;;  %v2844_v43 = vpop.f32.mrf.mxu1 }
 0x136   : > { %v2846_v44 = vpop.f32.mrf.mxu0  ;;  %v2848_v45 = vpop.f32.mrf.mxu1 }
 0x138   : > { %v2850_v47 = vpop.f32.mrf.mxu0  ;;  %v2852_v48 = vpop.f32.mrf.mxu1 }
 0x139   : > { %3061 = vst [vmem:[#allocation13_spill] sm:$0xff] %v2850_v47 }
 0x13a   : > { %v2854_v51 = vpop.f32.mrf.mxu0  ;;  %v2856_v54 = vpop.f32.mrf.mxu1 }
 0x13b   : > { %3062 = vst [vmem:[#allocation14_spill] sm:$0xff] %v2854_v51 }
 0x13c   : > { %v2858_v56 = vpop.f32.mrf.mxu0  ;;  %v2860_v59 = vpop.f32.mrf.mxu1 }
 0x13d   : > { %3063 = vst [vmem:[#allocation15_spill] sm:$0xff] %v2858_v56  ;;  %v2178_v56 = vadd.f32 %v2177_v63, %v2176_v60  ;;  %v2187_v63 = vadd.f32 %v2186_v22, %v2185_v18  ;;  %v1068_v18 = vadd.f32 %v2770_v20, %v2789_v42 }
 0x13e   : > { %v2862_v62 = vpop.f32.mrf.mxu0  ;;  %v2864_v1 = vpop.f32.mrf.mxu1 }
 0x13f   : > { %3064 = vst [vmem:[#allocation16_spill] sm:$0xff] %v2862_v62 }
 0x140   : > { %v2866_v5 = vpop.f32.mrf.mxu0  ;;  %v2868_v10 = vpop.f32.mrf.mxu1 }
 0x141   : > { %3065 = vst [vmem:[#allocation17_spill] sm:$0xff] %v2866_v5 }
 0x142   : > { %v2870_v12 = vpop.f32.mrf.mxu0  ;;  %v2872_v39 = vpop.f32.mrf.mxu1 }
 0x143   : > { %3066 = vst [vmem:[#allocation18_spill] sm:$0xff] %v2870_v12  ;;  %v1060_v12 = vadd.f32 %v2762_v8, %v2789_v42 }
 0x144   : > { %v2874_v33 = vpop.f32.mrf.mxu0  ;;  %v2876_v27 = vpop.f32.mrf.mxu1 }
 0x145   : > { %3067 = vst [vmem:[#allocation19_spill] sm:$0xff] %v2874_v33  ;;  %v1221_v35 = vadd.f32 %v2175_v9, %v1060_v12  ;;  %v1076_v9 = vadd.f32 %v2778_v32, %v2789_v42 }
 0x146   : > { %v2878_v21 = vpop.f32.mrf.mxu0  ;;  %v2880_v3 = vpop.f32.mrf.mxu1 }
 0x147   : > { %3068 = vst [vmem:[#allocation20_spill] sm:$0xff] %v2878_v21  ;;  %v1063_v21 = vadd.f32 %v2766_v14, %v2789_v42  ;;  %v1237_v20 = vadd.f32 %v2187_v63, %v1076_v9 }
 0x148   : > { %v2882_v15 = vpop.f32.mrf.mxu0  ;;  %v2884_v61 = vpop.f32.mrf.mxu1 }
 0x149   : > { %3069 = vst [vmem:[#allocation21_spill] sm:$0xff] %v2882_v15  ;;  %v2172_v15 = vadd.f32 %v2798_v52, %v2794_v49  ;;  %v1224_v8 = vadd.f32 %v2178_v56, %v1063_v21  ;;  %v2181_v49 = vadd.f32 %v2808_v6, %v2806_v4 }
 0x14a   : > { %v2886_v5 = vpop.f32.mrf.mxu0  ;;  %v2888_v62 = vpop.f32.mrf.mxu1 }
 0x14b   : > { %3070 = vst [vmem:[#allocation22_spill] sm:$0xff] %v2886_v5  ;;  %v1055_v5 = vadd.f32 %v2758_v2, %v2789_v42 }
 0x14c   : > { %v2892_v33 = vpop.f32.mrf.mxu1  ;;  %v2305_v37 = vpop.f32.mrf.mxu0 }
 0x14d   : > { %3071 = vst [vmem:[#allocation23_spill] sm:$0xff] %v2892_v33  ;;  %v1382_v51 = vadd.f32 %v2305_v37, %v1221_v35  ;;  %v1216_v31 = vadd.f32 %v2172_v15, %v1055_v5  ;;  %v2190_v35 = vadd.f32 %v2189_v28, %v2188_v24  ;;  %v2184_v15 = vadd.f32 %v2814_v13, %v2812_v11 }
 0x14e   : > { %v2898_v55 = vpop.f32.mrf.mxu1  ;;  %v1373_v57 = vpop.f32.mrf.mxu0 }
 0x14f   : > { %v1374_v33 = vadd.f32 %v1373_v57, %v2796_v50  ;;  %v1502_v21 = vmax.f32 %v1382_v51, 0.0  ;;  %v1079_v50 = vadd.f32 %v2782_v38, %v2789_v42  ;;  %v1071_v38 = vadd.f32 %v2774_v26, %v2789_v42 }
 0x150   : > { %v2902_v47 = vpop.f32.mrf.mxu1  ;;  %v2306_v60 = vpop.f32.mrf.mxu0  ;;  %v1229_v51 = vadd.f32 %v2181_v49, %v1068_v18  ;;  %v1092_v26 = vadd.f32 %v2802_v58, %v2789_v42  ;;  %v2196_v58 = vadd.f32 %v2840_v40, %v2836_v36 }
 0x151   : > { %v1385_v14 = vadd.f32 %v2306_v60, %v1224_v8  ;;  %v1500_v6 = vmax.f32 %v1374_v33, 0.0  ;;  %v1240_v5 = vadd.f32 %v2190_v35, %v1079_v50  ;;  %v2199_v33 = vadd.f32 %v2848_v45, %v2844_v43 }
 0x152   : > { %v2910_v52 = vpop.f32.mrf.mxu1  ;;  %v1376_v2 = vpop.f32.mrf.mxu0  ;;  %v1232_v63 = vadd.f32 %v2184_v15, %v1071_v38  ;;  %v1084_v45 = vadd.f32 %v2792_v46, %v2789_v42  ;;  %v1087_v50 = vadd.f32 %v2800_v53, %v2789_v42  ;;  %v2099_v46 = vadd.f32 %v2820_v19, %v2818_v17 }
 0x153   : > { %v1503_v37 = vmax.f32 %v1385_v14, 0.0  ;;  %v1377_v56 = vadd.f32 %v1376_v2, %v1216_v31  ;;  %v2193_v14 = vadd.f32 %v2832_v34, %v2828_v30  ;;  %v2202_v2 = vadd.f32 %v2856_v54, %v2852_v48 }
 0x154   : > { %v2923_v32 = vpop.f32.mrf.mxu1  ;;  %v2309_v4 = vpop.f32.mrf.mxu0  ;;  %v1253_v54 = vadd.f32 %v2199_v33, %v1092_v26  ;;  %v2211_v53 = vadd.f32 %v2880_v3, %v2876_v27  ;;  %v1248_v19 = vadd.f32 %v2196_v58, %v1087_v50  ;;  %v1100_v3 = vadd.f32 %v2810_v7, %v2789_v42 }
 0x155   : > { %v1952_v22 = vpack.c.bf16 %v1503_v37, %v1502_v21  ;;  %v1501_v24 = vmax.f32 %v1377_v56, 0.0  ;;  %v1398_v31 = vadd.f32 %v2309_v4, %v1237_v20  ;;  %v1095_v37 = vadd.f32 %v2804_v0, %v2789_v42 }
 0x156   : > { %v2927_v28 = vpop.f32.mrf.mxu1  ;;  %v1389_v11 = vpop.f32.mrf.mxu0  ;;  %v1245_v40 = vadd.f32 %v2193_v14, %v1084_v45  ;;  %v2208_v33 = vadd.f32 %v2872_v39, %v2868_v10  ;;  %v3072_v10 = vld [vmem:[#allocation10_spill] sm:$0xff] }
 0x157   : > { %2024 = vst [vmem:[%s2921_s29 + $0x8] sm:$0xff] %v1952_v22   ;;  %v1947_v13 = vpack.c.bf16 %v1501_v24, %v1500_v6  ;;  %v1390_v8 = vadd.f32 %v1389_v11, %v1229_v51  ;;  %v1506_v35 = vmax.f32 %v1398_v31, 0.0  ;;  %v1256_v6 = vadd.f32 %v2202_v2, %v1095_v37  ;;  %v3074_v45 = vld [vmem:[#allocation14_spill] sm:$0xff] }
 0x158   : > { %v2930_v12 = vpop.f32.mrf.mxu1  ;;  %v2310_v57 = vpop.f32.mrf.mxu0  ;;  %v2102_v22 = vadd.f32 %v2824_v25, %v2822_v23  ;;  %v1108_v11 = vadd.f32 %v2099_v46, %v2789_v42  ;;  %v2214_v23 = vadd.f32 %v2888_v62, %v2884_v61  ;;  %v1103_v61 = vadd.f32 %v2816_v16, %v2789_v42  ;;  %v3077_v46 = vld [vmem:[#allocation23_spill] sm:$0xff] }
 0x159   : > { %1948 = vst [vmem:[%s2921_s29] sm:$0xff] %v1947_v13   ;;  %v1401_v60 = vadd.f32 %v2310_v57, %v1240_v5  ;;  %v1504_v56 = vmax.f32 %v1390_v8, 0.0  ;;  %v2205_v13 = vadd.f32 %v2864_v1, %v2860_v59  ;;  %v2111_v62 = vadd.f32 %v2846_v44, %v2842_v41 }
 0x15a   : > { %v2939_v9 = vpop.f32.mrf.mxu1  ;;  %v1392_v49 = vpop.f32.mrf.mxu0  ;;  %v1111_v27 = vadd.f32 %v2102_v22, %v2789_v42  ;;  %v1269_v26 = vadd.f32 %v2211_v53, %v1108_v11  ;;  %v2223_v16 = vadd.f32 %v2927_v28, %v2923_v32 }
 0x15b   : > { %v1507_v21 = vmax.f32 %v1401_v60, 0.0  ;;  %v1393_v43 = vadd.f32 %v1392_v49, %v1232_v63  ;;  %v1124_v50 = vadd.f32 %v2111_v62, %v2789_v42 }
 0x15c   : > { %v2949_v30 = vpop.f32.mrf.mxu1  ;;  %v2313_v34 = vpop.f32.mrf.mxu0  ;;  %v1272_v39 = vadd.f32 %v2214_v23, %v1111_v27 }
 0x15d   : > { %v1962_v18 = vpack.c.bf16 %v1507_v21, %v1506_v35  ;;  %v1505_v48 = vmax.f32 %v1393_v43, 0.0  ;;  %v1414_v36 = vadd.f32 %v2313_v34, %v1253_v54  ;;  %v1261_v35 = vadd.f32 %v2205_v13, %v1100_v3  ;;  %v3073_v43 = vld [vmem:[#allocation13_spill] sm:$0xff]  ;;  %v3079_v13 = vld [vmem:[#allocation20_spill] sm:$0xff] }
 0x15e   : > { %v2955_v15 = vpop.f32.mrf.mxu1  ;;  %v1405_v0 = vpop.f32.mrf.mxu0  ;;  %v2105_v21 = vadd.f32 %v3072_v10, %v2826_v29  ;;  %v2114_v37 = vadd.f32 %v3074_v45, %v3073_v43  ;;  %v2217_v29 = vadd.f32 %v2898_v55, %v3077_v46  ;;  %v1285_v11 = vadd.f32 %v2223_v16, %v1124_v50 }
 0x15f   : > { %2026 = vst [vmem:[%s2921_s29 + $0x18] sm:$0xff] %v1962_v18   ;;  %v1957_v4 = vpack.c.bf16 %v1505_v48, %v1504_v56  ;;  %v1406_v38 = vadd.f32 %v1405_v0, %v1245_v40  ;;  %v1510_v25 = vmax.f32 %v1414_v36, 0.0  ;;  %v1264_v56 = vadd.f32 %v2208_v33, %v1103_v61  ;;  %v3075_v18 = vld [vmem:[#allocation11_spill] sm:$0xff]  ;;  %v3076_v48 = vld [vmem:[#allocation12_spill] sm:$0xff] }
 0x160   : > { %v2960_v24 = vpop.f32.mrf.mxu1  ;;  %v2314_v20 = vpop.f32.mrf.mxu0  ;;  %v2108_v54 = vadd.f32 %v3076_v48, %v3075_v18  ;;  %v2226_v36 = vadd.f32 %v2939_v9, %v2930_v12  ;;  %v1127_v22 = vadd.f32 %v2114_v37, %v2789_v42  ;;  %v3078_v9 = vld [vmem:[#allocation19_spill] sm:$0xff] }
 0x161   : > { %2025 = vst [vmem:[%s2921_s29 + $0x10] sm:$0xff] %v1957_v4   ;;  %v1417_v17 = vadd.f32 %v2314_v20, %v1256_v6  ;;  %v1508_v1 = vmax.f32 %v1406_v38, 0.0  ;;  %v1116_v6 = vadd.f32 %v2105_v21, %v2789_v42  ;;  %v2220_v20 = vadd.f32 %v2910_v52, %v2902_v47  ;;  %v3080_v47 = vld [vmem:[#allocation15_spill] sm:$0xff]  ;;  %v3081_v52 = vld [vmem:[#allocation16_spill] sm:$0xff] }
 0x162   : > { %v2968_v31 = vpop.f32.mrf.mxu1  ;;  %v1408_v51 = vpop.f32.mrf.mxu0  ;;  %v1119_v12 = vadd.f32 %v2108_v54, %v2789_v42  ;;  %v1288_v27 = vadd.f32 %v2226_v36, %v1127_v22  ;;  %v2117_v33 = vadd.f32 %v3081_v52, %v3080_v47  ;;  %v2229_v21 = vadd.f32 %v2955_v15, %v2949_v30  ;;  %v3086_v22 = vld [vmem:[#allocation4_spill] sm:$0xff] }
 0x163   : > { %v1511_v5 = vmax.f32 %v1417_v17, 0.0  ;;  %v1409_v57 = vadd.f32 %v1408_v51, %v1248_v19  ;;  %v2123_v51 = vadd.f32 %v3079_v13, %v3078_v9  ;;  %v1277_v3 = vadd.f32 %v2217_v29, %v1116_v6  ;;  %v3087_v13 = vld [vmem:[#allocation2_spill] sm:$0xff] }
 0x164   : > { %v2233_v8 = vpop.f32.mrf.mxu1  ;;  %v2317_v59 = vpop.f32.mrf.mxu0 }
 0x165   : > { %v1972_v60 = vpack.c.bf16 %v1511_v5, %v1510_v25  ;;  %v1509_v63 = vmax.f32 %v1409_v57, 0.0  ;;  %v1430_v2 = vadd.f32 %v2317_v59, %v1269_v26  ;;  %v3082_v59 = vld [vmem:[#allocation21_spill] sm:$0xff]  ;;  %v1140_v10 = vadd.f32 %v2123_v51, %v2789_v42 }
 0x166   : > { %v2234_v14 = vpop.f32.mrf.mxu1  ;;  %v1421_v7 = vpop.f32.mrf.mxu0  ;;  %v1148_v51 = vadd.f32 %v3087_v13, %v2789_v42 }
 0x167   : > { %2028 = vst [vmem:[%s2921_s29 + $0x28] sm:$0xff] %v1972_v60   ;;  %v1967_v49 = vpack.c.bf16 %v1509_v63, %v1508_v1  ;;  %v1422_v41 = vadd.f32 %v1421_v7, %v1261_v35  ;;  %v1514_v40 = vmax.f32 %v1430_v2, 0.0  ;;  %v3083_v1 = vld [vmem:[#allocation22_spill] sm:$0xff]  ;;  %v2235_v61 = vadd.f32 %v2234_v14, %v2233_v8  ;;  %v3084_v2 = vld [vmem:[#allocation17_spill] sm:$0xff] }
 0x168   : > { %v2236_v58 = vpop.f32.mrf.mxu1  ;;  %v2318_v34 = vpop.f32.mrf.mxu0  ;;  %v2126_v60 = vadd.f32 %v3083_v1, %v3082_v59  ;;  %v3085_v35 = vld [vmem:[#allocation18_spill] sm:$0xff]  ;;  %v1132_v8 = vadd.f32 %v2117_v33, %v2789_v42  ;;  %v3089_v33 = vld [vmem:[#allocation3_spill] sm:$0xff] }
 0x169   : > { %2027 = vst [vmem:[%s2921_s29 + $0x20] sm:$0xff] %v1967_v49   ;;  %v1433_v44 = vadd.f32 %v2318_v34, %v1272_v39  ;;  %v1512_v17 = vmax.f32 %v1422_v41, 0.0  ;;  %v1280_v49 = vadd.f32 %v2220_v20, %v1119_v12  ;;  %v2120_v39 = vadd.f32 %v3085_v35, %v3084_v2 }
 0x16a   : > { %v2237_v0 = vpop.f32.mrf.mxu1  ;;  %v1424_v4 = vpop.f32.mrf.mxu0  ;;  %v1143_v14 = vadd.f32 %v2126_v60, %v2789_v42  ;;  %v1301_v15 = vadd.f32 %v2235_v61, %v1140_v10  ;;  %v1156_v20 = vadd.f32 %v3086_v22, %v2789_v42  ;;  %v1151_v59 = vadd.f32 %v3089_v33, %v2789_v42  ;;  %v3093_v22 = vld [vmem:[#allocation9_spill] sm:$0xff] }
 0x16b   : > { %v1515_v32 = vmax.f32 %v1433_v44, 0.0  ;;  %v1425_v28 = vadd.f32 %v1424_v4, %v1264_v56  ;;  %v2238_v37 = vadd.f32 %v2237_v0, %v2236_v58  ;;  %v2232_v44 = vadd.f32 %v2968_v31, %v2960_v24 }
 0x16c   : > { %v2239_v53 = vpop.f32.mrf.mxu1  ;;  %v2321_v38 = vpop.f32.mrf.mxu0  ;;  %v1135_v58 = vadd.f32 %v2120_v39, %v2789_v42  ;;  %v1293_v4 = vadd.f32 %v2229_v21, %v1132_v8 }
 0x16d   : > { %v1982_v55 = vpack.c.bf16 %v1515_v32, %v1514_v40  ;;  %v1513_v19 = vmax.f32 %v1425_v28, 0.0  ;;  %v1446_v57 = vadd.f32 %v2321_v38, %v1285_v11  ;;  %v1304_v36 = vadd.f32 %v2238_v37, %v1143_v14 }
 0x16e   : > { %v2240_v23 = vpop.f32.mrf.mxu1  ;;  %v1437_v25 = vpop.f32.mrf.mxu0  ;;  %v1296_v6 = vadd.f32 %v2232_v44, %v1135_v58 }
 0x16f   : > { %2030 = vst [vmem:[%s2921_s29 + $0x38] sm:$0xff] %v1982_v55   ;;  %v1977_v5 = vpack.c.bf16 %v1513_v19, %v1512_v17  ;;  %v1438_v62 = vadd.f32 %v1437_v25, %v1277_v3  ;;  %v1518_v34 = vmax.f32 %v1446_v57, 0.0  ;;  %v2241_v38 = vadd.f32 %v2240_v23, %v2239_v53  ;;  %v3088_v25 = vld [vmem:[#allocation5_spill] sm:$0xff] }
 0x170   : > { %v2242_v63 = vpop.f32.mrf.mxu1  ;;  %v2322_v26 = vpop.f32.mrf.mxu0 }
 0x171   : > { %2029 = vst [vmem:[%s2921_s29 + $0x30] sm:$0xff] %v1977_v5   ;;  %v1449_v7 = vadd.f32 %v2322_v26, %v1288_v27  ;;  %v1516_v48 = vmax.f32 %v1438_v62, 0.0  ;;  %v1159_v5 = vadd.f32 %v3088_v25, %v2789_v42  ;;  %v1309_v62 = vadd.f32 %v2241_v38, %v1148_v51 }
 0x172   : > { %v2243_v43 = vpop.f32.mrf.mxu1  ;;  %v1440_v45 = vpop.f32.mrf.mxu0 }
 0x173   : > { %v1519_v16 = vmax.f32 %v1449_v7, 0.0  ;;  %v1441_v41 = vadd.f32 %v1440_v45, %v1280_v49  ;;  %v2244_v57 = vadd.f32 %v2243_v43, %v2242_v63 }
 0x174   : > { %v2245_v56 = vpop.f32.mrf.mxu1  ;;  %v2325_v18 = vpop.f32.mrf.mxu0 }
 0x175   : > { %v1992_v54 = vpack.c.bf16 %v1519_v16, %v1518_v34  ;;  %v1517_v30 = vmax.f32 %v1441_v41, 0.0  ;;  %v1462_v0 = vadd.f32 %v2325_v18, %v1301_v15  ;;  %v1312_v39 = vadd.f32 %v2244_v57, %v1151_v59  ;;  %v3090_v16 = vld [vmem:[#allocation6_spill] sm:$0xff] }
 0x176   : > { %v2246_v50 = vpop.f32.mrf.mxu1  ;;  %v1453_v46 = vpop.f32.mrf.mxu0  ;;  %v1164_v41 = vadd.f32 %v3090_v16, %v2789_v42 }
 0x177   : > { %2032 = vst [vmem:[%s2921_s29 + $0x48] sm:$0xff] %v1992_v54   ;;  %v1987_v29 = vpack.c.bf16 %v1517_v30, %v1516_v48  ;;  %v2247_v24 = vadd.f32 %v2246_v50, %v2245_v56  ;;  %v1454_v31 = vadd.f32 %v1453_v46, %v1293_v4  ;;  %v1522_v19 = vmax.f32 %v1462_v0, 0.0  ;;  %v3091_v54 = vld [vmem:[#allocation7_spill] sm:$0xff]  ;;  %v3092_v50 = vld [vmem:[#allocation8_spill] sm:$0xff] }
 0x178   : > { %v2248_v40 = vpop.f32.mrf.mxu1  ;;  %v2326_v32 = vpop.f32.mrf.mxu0  ;;  %v1167_v30 = vadd.f32 %v3091_v54, %v2789_v42  ;;  %v1172_v46 = vadd.f32 %v3092_v50, %v2789_v42 }
 0x179   : > { %2031 = vst [vmem:[%s2921_s29 + $0x40] sm:$0xff] %v1987_v29   ;;  %v1465_v28 = vadd.f32 %v2326_v32, %v1304_v36  ;;  %v1520_v47 = vmax.f32 %v1454_v31, 0.0  ;;  %v1317_v23 = vadd.f32 %v2247_v24, %v1156_v20  ;;  %v1175_v20 = vadd.f32 %v3093_v22, %v2789_v42 }
 0x17a   : > { %v2249_v17 = vpop.f32.mrf.mxu1  ;;  %v1456_v55 = vpop.f32.mrf.mxu0 }
 0x17b   : > { %v1523_v11 = vmax.f32 %v1465_v28, 0.0  ;;  %v2250_v12 = vadd.f32 %v2249_v17, %v2248_v40  ;;  %v1457_v9 = vadd.f32 %v1456_v55, %v1296_v6 }
 0x17c   : > { %v2251_v3 = vpop.f32.mrf.mxu1  ;;  %v2329_v27 = vpop.f32.mrf.mxu0 }
 0x17d   : > { %v2002_v52 = vpack.c.bf16 %v1523_v11, %v1522_v19  ;;  %v1521_v53 = vmax.f32 %v1457_v9, 0.0  ;;  %v1478_v61 = vadd.f32 %v2329_v27, %v1317_v23  ;;  %v1320_v7 = vadd.f32 %v2250_v12, %v1159_v5 }
 0x17e   : > { %v2252_v1 = vpop.f32.mrf.mxu1  ;;  %v1469_v60 = vpop.f32.mrf.mxu0 }
 0x17f   : > { %2034 = vst [vmem:[%s2921_s29 + $0x58] sm:$0xff] %v2002_v52   ;;  %v1997_v26 = vpack.c.bf16 %v1521_v53, %v1520_v47  ;;  %v1470_v63 = vadd.f32 %v1469_v60, %v1309_v62  ;;  %v1526_v43 = vmax.f32 %v1478_v61, 0.0  ;;  %v2253_v45 = vadd.f32 %v2252_v1, %v2251_v3 }
 0x180   : > { %v2254_v49 = vpop.f32.mrf.mxu1  ;;  %v2330_v2 = vpop.f32.mrf.mxu0 }
 0x181   : > { %2033 = vst [vmem:[%s2921_s29 + $0x50] sm:$0xff] %v1997_v26   ;;  %v1481_v35 = vadd.f32 %v2330_v2, %v1320_v7  ;;  %v1524_v44 = vmax.f32 %v1470_v63, 0.0  ;;  %v1325_v4 = vadd.f32 %v2253_v45, %v1164_v41 }
 0x182   : > { %v2255_v10 = vpop.f32.mrf.mxu1  ;;  %v1472_v21 = vpop.f32.mrf.mxu0 }
 0x183   : > { %v1527_v37 = vmax.f32 %v1481_v35, 0.0  ;;  %v1473_v34 = vadd.f32 %v1472_v21, %v1312_v39  ;;  %v2256_v18 = vadd.f32 %v2255_v10, %v2254_v49 }
 0x184   : > { %v2257_v8 = vpop.f32.mrf.mxu1  ;;  %v2333_v14 = vpop.f32.mrf.mxu0 }
 0x185   : > { %v2012_v56 = vpack.c.bf16 %v1527_v37, %v1526_v43  ;;  %v1525_v48 = vmax.f32 %v1473_v34, 0.0  ;;  %v1328_v31 = vadd.f32 %v2256_v18, %v1167_v30 }
 0x186   : > { %v2258_v15 = vpop.f32.mrf.mxu1  ;;  %v1485_v58 = vpop.f32.mrf.mxu0 }
 0x187   : > { %2036 = vst [vmem:[%s2921_s29 + $0x68] sm:$0xff] %v2012_v56   ;;  %v2007_v29 = vpack.c.bf16 %v1525_v48, %v1524_v44  ;;  %v2259_v0 = vadd.f32 %v2258_v15, %v2257_v8  ;;  %v1486_v24 = vadd.f32 %v1485_v58, %v1325_v4 }
 0x188   : > { %v2260_v36 = vpop.f32.mrf.mxu1  ;;  %v2334_v40 = vpop.f32.mrf.mxu0 }
 0x189   : > { %2035 = vst [vmem:[%s2921_s29 + $0x60] sm:$0xff] %v2007_v29   ;;  %v1333_v32 = vadd.f32 %v2259_v0, %v1172_v46  ;;  %v1528_v19 = vmax.f32 %v1486_v24, 0.0 }
 0x18a   : > { %v2261_v28 = vpop.f32.mrf.mxu1  ;;  %v1488_v6 = vpop.f32.mrf.mxu0 }
 0x18b   : > { %v2262_v38 = vadd.f32 %v2261_v28, %v2260_v36  ;;  %v1489_v17 = vadd.f32 %v1488_v6, %v1328_v31  ;;  %v1494_v55 = vadd.f32 %v2333_v14, %v1333_v32 }
 0x18d   : > { %v1336_v11 = vadd.f32 %v2262_v38, %v1175_v20  ;;  %v1529_v12 = vmax.f32 %v1489_v17, 0.0  ;;  %v1530_v51 = vmax.f32 %v1494_v55, 0.0 }
 0x18f   : > { %v1497_v9 = vadd.f32 %v2334_v40, %v1336_v11  ;;  %v2017_v13 = vpack.c.bf16 %v1529_v12, %v1528_v19 }
 0x191   : > { %v1531_v25 = vmax.f32 %v1497_v9, 0.0  ;;  %2037 = vst [vmem:[%s2921_s29 + $0x70] sm:$0xff] %v2017_v13  }
 0x193   : > { %v2022_v5 = vpack.c.bf16 %v1531_v25, %v1530_v51 }
 0x195   : > { %2038 = vst [vmem:[%s2921_s29 + $0x78] sm:$0xff] %v2022_v5  }
 0x196 PF: > { %s13_s12 = sadd.s32 1, %s2518_s12  }
 0x197   : > { %p10_p4 = scmp.ge.s32.totalorder %s13_s12, 4  }
 0x199   :  { %12 = sbr.rel (!%p10_p4) target bundleno = 1 (0x1), region = 62 }

// kernel: cvae_forward.5
= control target key start
LH: loop header
LB: loop body
LE: loop exit
PB: predicated region body
PF: predicated region fallthrough
CT: control target
= control target key end

     0   :  { %s970_s1 = inlined_call_operand.vmem [shape: bf16[640,128], index: 1, kind: input, shape index: {}]   ;;  %s971_s0 = inlined_call_operand.vmem [shape: bf16[32,640], index: 0, kind: input, shape index: {}]   ;;  %s972_s2 = inlined_call_operand.vmem [shape: f32[1,128], index: 2, kind: input, shape index: {}]   ;;  %s973_s3 = inlined_call_operand.vmem [shape: bf16[32,128], index: 3, kind: output, shape index: {}]  }
   0x1   :  { %v737_v0 = vld [vmem:[%s970_s1 + $0x78] sm:$0xff]   ;;  %v741_v4 = vld [vmem:[%s970_s1 + $0x70] sm:$0xff]   ;;  %v745_v8 = vld [vmem:[%s970_s1 + $0x68] sm:$0xff]  }
   0x2   :  { %v738_v1 = vld [vmem:[%s970_s1 + $0x38] sm:$0xff]   ;;  %651 = vmatprep.subr.bf16.mxu0 %v737_v0  ;;  %v742_v5 = vld [vmem:[%s970_s1 + $0x30] sm:$0xff]   ;;  %v746_v9 = vld [vmem:[%s970_s1 + $0x28] sm:$0xff]  }
   0x3   :  { %v739_v2 = vld [vmem:[%s970_s1 + $0xf8] sm:$0xff]   ;;  %652 = vmatpush3.bf16.msra.mxu0 %v738_v1  ;;  %v743_v6 = vld [vmem:[%s970_s1 + $0xf0] sm:$0xff]   ;;  %v747_v10 = vld [vmem:[%s970_s1 + $0xe8] sm:$0xff]  }
   0x4   :  { %v740_v3 = vld [vmem:[%s970_s1 + $0xb8] sm:$0xff]   ;;  %679 = vmatprep.subr.bf16.mxu1 %v739_v2  ;;  %653 = vmatprep.subr.bf16.mxu0 %v741_v4  ;;  %v744_v7 = vld [vmem:[%s970_s1 + $0xb0] sm:$0xff]   ;;  %v748_v11 = vld [vmem:[%s970_s1 + $0xa8] sm:$0xff]  }
   0x5   :  { %680 = vmatpush3.bf16.msra.mxu1 %v740_v3  ;;  %v749_v12 = vld [vmem:[%s970_s1 + $0x60] sm:$0xff]   ;;  %v753_v16 = vld [vmem:[%s970_s1 + $0x58] sm:$0xff]   ;;  %v757_v20 = vld [vmem:[%s970_s1 + $0x50] sm:$0xff]  }
   0x6   :  { %681 = vmatprep.subr.bf16.mxu1 %v743_v6  ;;  %v750_v13 = vld [vmem:[%s970_s1 + $0x20] sm:$0xff]   ;;  %v754_v17 = vld [vmem:[%s970_s1 + $0x18] sm:$0xff]   ;;  %v758_v21 = vld [vmem:[%s970_s1 + $0x10] sm:$0xff]  }
   0x7   :  { %654 = vmatpush3.bf16.msra.mxu0 %v742_v5  ;;  %v751_v14 = vld [vmem:[%s970_s1 + $0xe0] sm:$0xff]   ;;  %v755_v18 = vld [vmem:[%s970_s1 + $0xd8] sm:$0xff]   ;;  %v759_v22 = vld [vmem:[%s970_s1 + $0xd0] sm:$0xff]  }
   0x8   :  { %655 = vmatprep.subr.bf16.mxu0 %v745_v8  ;;  %v752_v15 = vld [vmem:[%s970_s1 + $0xa0] sm:$0xff]   ;;  %v756_v19 = vld [vmem:[%s970_s1 + $0x98] sm:$0xff]   ;;  %v760_v23 = vld [vmem:[%s970_s1 + $0x90] sm:$0xff]  }
   0x9   :  { %682 = vmatpush3.bf16.msra.mxu1 %v744_v7  ;;  %v761_v24 = vld [vmem:[%s970_s1 + $0x48] sm:$0xff]   ;;  %v765_v28 = vld [vmem:[%s970_s1 + $0x40] sm:$0xff]   ;;  %v772_v34 = vld [vmem:[%s970_s1 + $0x138] sm:$0xff]  }
   0xa   :  { %683 = vmatprep.subr.bf16.mxu1 %v747_v10  ;;  %v762_v25 = vld [vmem:[%s970_s1 + $0x8] sm:$0xff]   ;;  %v766_v29 = vld [vmem:[%s970_s1] sm:$0xff]   ;;  %v776_v37 = vld [vmem:[%s970_s1 + $0x130] sm:$0xff]  }
   0xb   :  { %656 = vmatpush3.bf16.msra.mxu0 %v746_v9  ;;  %v763_v26 = vld [vmem:[%s970_s1 + $0xc8] sm:$0xff]   ;;  %v767_v30 = vld [vmem:[%s970_s1 + $0xc0] sm:$0xff]   ;;  %v779_v44 = vld [vmem:[%s970_s1 + $0x118] sm:$0xff]  }
   0xc   :  { %657 = vmatprep.subr.bf16.mxu0 %v749_v12  ;;  %v764_v27 = vld [vmem:[%s970_s1 + $0x88] sm:$0xff]   ;;  %v768_v31 = vld [vmem:[%s971_s0] ss:$20 sps:$4 sm:$0xff]   ;;  %v770_v32 = vld [vmem:[%s971_s0 + $0x4] ss:$20 sps:$4 sm:$0xff]  }
   0xd   :  { %684 = vmatpush3.bf16.msra.mxu1 %v748_v11  ;;  %v771_v33 = vld [vmem:[%s970_s1 + $0x80] sm:$0xff]   ;;  %438 = vmatprep.mubr.bf16.mxu0 %v770_v32  ;;  %v773_v35 = vld [vmem:[%s971_s0 + $0x8] ss:$20 sps:$4 sm:$0xff]   ;;  %v786_v46 = vld [vmem:[%s970_s1 + $0x110] sm:$0xff]  }
   0xe   :  { %685 = vmatprep.subr.bf16.mxu1 %v751_v14  ;;  %v775_v36 = vld [vmem:[%s971_s0 + $0xc] ss:$20 sps:$4 sm:$0xff]   ;;  %v782_v41 = vld [vmem:[%s971_s0 + $0x28] ss:$20 sps:$4 sm:$0xff]   ;;  %v785_v43 = vld [vmem:[%s971_s0 + $0x30] ss:$20 sps:$4 sm:$0xff]  }
   0xf   :  { %658 = vmatpush3.bf16.msra.mxu0 %v750_v13  ;;  %487 = vmatprep.mubr.bf16.mxu1 %v775_v36  ;;  %v777_v38 = vld [vmem:[%s970_s1 + $0x128] sm:$0xff]   ;;  %v778_v39 = vld [vmem:[%s970_s1 + $0x120] sm:$0xff]  }
  0x10   :  { %659 = vmatprep.subr.bf16.mxu0 %v753_v16  ;;  %v780_v40 = vld [vmem:[%s971_s0 + $0x2c] ss:$20 sps:$4 sm:$0xff]   ;;  %v783_v42 = vld [vmem:[%s971_s0 + $0x34] ss:$20 sps:$4 sm:$0xff]   ;;  %v789_v45 = vld [vmem:[%s971_s0 + $0x10] ss:$20 sps:$4 sm:$0xff]  }
  0x11   :  { %686 = vmatpush3.bf16.msra.mxu1 %v752_v15  ;;  %v787_v47 = vld [vmem:[%s970_s1 + $0x108] sm:$0xff]   ;;  %v788_v48 = vld [vmem:[%s970_s1 + $0x100] sm:$0xff]  }
  0x12   :  { %687 = vmatprep.subr.bf16.mxu1 %v755_v18  ;;  %v790_v49 = vld [vmem:[%s971_s0 + $0x38] ss:$20 sps:$4 sm:$0xff]   ;;  %v581_v4 = vld [vmem:[%s972_s2] ss:$0 sm:$0xff] }
  0x13   :  { %660 = vmatpush3.bf16.msra.mxu0 %v754_v17 }
  0x14   :  { %661 = vmatprep.subr.bf16.mxu0 %v757_v20 }
  0x15   :  { %688 = vmatpush3.bf16.msra.mxu1 %v756_v19 }
  0x16   :  { %689 = vmatprep.subr.bf16.mxu1 %v759_v22 }
  0x17   :  { %662 = vmatpush3.bf16.msra.mxu0 %v758_v21 }
  0x18   :  { %663 = vmatprep.subr.bf16.mxu0 %v761_v24 }
  0x19   :  { %690 = vmatpush3.bf16.msra.mxu1 %v760_v23 }
  0x1a   :  { %691 = vmatprep.subr.bf16.mxu1 %v763_v26 }
  0x1b   :  { %664 = vmatpush3.bf16.msra.mxu0 %v762_v25 }
  0x1c   :  { %665 = vmatprep.subr.bf16.mxu0 %v765_v28 }
  0x1d   :  { %692 = vmatpush3.bf16.msra.mxu1 %v764_v27 }
  0x1e   :  { %693 = vmatprep.subr.bf16.mxu1 %v767_v30 }
  0x1f   :  { %666 = vmatpush3.bf16.msra.mxu0 %v766_v29 }
  0x20   :  { %717 = vmatprep.subr.bf16.mxu0 %v772_v34 }
  0x21   :  { %694 = vmatpush3.bf16.msra.mxu1 %v771_v33 }
  0x22   :  { %439 = vmatmul.mubr.bf16.vlgmr.msra.gmra.mxu0 %v768_v31 }
  0x23   :  { %718 = vmatpush3.bf16.msra.mxu0 %v772_v34  ;;  %446 = vmatprep.mubr.bf16.mxu0 %v780_v40 }
  0x24   :  { %488 = vmatmul.mubr.bf16.vlgmr.msra.gmra.mxu1 %v773_v35  ;;  %719 = vmatprep.subr.bf16.mxu0 %v776_v37 }
  0x25   :  { %495 = vmatprep.mubr.bf16.mxu1 %v783_v42 }
  0x27   :  { %720 = vmatpush3.bf16.msra.mxu0 %v776_v37 }
  0x28   :  { %721 = vmatprep.subr.bf16.mxu0 %v777_v38 }
  0x2a   :  { %447 = vmatmul.mubr.bf16.gmra.mxu0 %v782_v41 }
  0x2b   :  { %722 = vmatpush3.bf16.msra.mxu0 %v777_v38  ;;  %733 = vmatprep.mubr.bf16.mxu0 %v789_v45 }
  0x2c   :  { %723 = vmatprep.subr.bf16.mxu0 %v778_v39  ;;  %496 = vmatmul.mubr.bf16.gmra.mxu1 %v785_v43 }
  0x2f   :  { %724 = vmatpush3.bf16.msra.mxu0 %v778_v39 }
  0x30   :  { %725 = vmatprep.subr.bf16.mxu0 %v779_v44 }
  0x33   :  { %726 = vmatpush3.bf16.msra.mxu0 %v779_v44 }
  0x34   :  { %727 = vmatprep.subr.bf16.mxu0 %v786_v46 }
  0x37   :  { %728 = vmatpush3.bf16.msra.mxu0 %v786_v46 }
  0x38   :  { %729 = vmatprep.subr.bf16.mxu0 %v787_v47 }
  0x3b   :  { %730 = vmatpush3.bf16.msra.mxu0 %v787_v47 }
  0x3c   :  { %731 = vmatprep.subr.bf16.mxu0 %v788_v48 }
  0x3f   :  { %732 = vmatpush3.bf16.msra.mxu0 %v788_v48 }
  0x42   :  { %734 = vmatmul.mubr.bf16.vlgmr.msra.gmra.mxu0 %v790_v49 }
  0xe2   :  { %v667_v50 = vpop.f32.mrf.mxu0 }
  0xe4   :  { %v668_v51 = vpop.f32.mrf.mxu0  ;;  %v695_v52 = vpop.f32.mrf.mxu1 }
  0xe5   :  { %v669_v2 = vadd.f32 %v668_v51, %v667_v50 }
  0xe6   :  { %v670_v53 = vpop.f32.mrf.mxu0  ;;  %v696_v54 = vpop.f32.mrf.mxu1 }
  0xe7   :  { %v441_v9 = vadd.f32 %v669_v2, %v581_v4  ;;  %v697_v10 = vadd.f32 %v696_v54, %v695_v52 }
  0xe8   :  { %v671_v55 = vpop.f32.mrf.mxu0  ;;  %v698_v56 = vpop.f32.mrf.mxu1 }
  0xe9   :  { %v672_v6 = vadd.f32 %v671_v55, %v670_v53  ;;  %v490_v19 = vadd.f32 %v697_v10, %v441_v9 }
  0xea   :  { %v673_v57 = vpop.f32.mrf.mxu0  ;;  %v699_v58 = vpop.f32.mrf.mxu1 }
  0xeb   :  { %v444_v14 = vadd.f32 %v672_v6, %v581_v4  ;;  %v700_v15 = vadd.f32 %v699_v58, %v698_v56 }
  0xec   :  { %v674_v59 = vpop.f32.mrf.mxu0  ;;  %v701_v60 = vpop.f32.mrf.mxu1 }
  0xed   :  { %v675_v1 = vadd.f32 %v674_v59, %v673_v57  ;;  %v493_v24 = vadd.f32 %v700_v15, %v444_v14 }
  0xee   :  { %v676_v61 = vpop.f32.mrf.mxu0  ;;  %v702_v62 = vpop.f32.mrf.mxu1 }
  0xef   :  { %v449_v7 = vadd.f32 %v675_v1, %v581_v4  ;;  %v703_v8 = vadd.f32 %v702_v62, %v701_v60 }
  0xf0   :  { %v677_v63 = vpop.f32.mrf.mxu0  ;;  %v704_v0 = vpop.f32.mrf.mxu1 }
  0xf1   :  { %v678_v3 = vadd.f32 %v677_v63, %v676_v61  ;;  %v498_v16 = vadd.f32 %v703_v8, %v449_v7 }
  0xf2   :  { %v705_v5 = vpop.f32.mrf.mxu1 }
  0xf3   :  { %v452_v11 = vadd.f32 %v678_v3, %v581_v4  ;;  %v706_v12 = vadd.f32 %v705_v5, %v704_v0 }
  0xf5   :  { %v501_v20 = vadd.f32 %v706_v12, %v452_v11 }
 0x102   :  { %v735_v13 = vpop.f32.mrf.mxu0 }
 0x103   :  { %v547_v18 = vadd.f32 %v735_v13, %v498_v16 }
 0x104   :  { %v538_v17 = vpop.f32.mrf.mxu0 }
 0x105   :  { %v539_v22 = vadd.f32 %v538_v17, %v490_v19  ;;  %v555_v26 = vmax.f32 %v547_v18, 0.0 }
 0x106   :  { %v736_v21 = vpop.f32.mrf.mxu0 }
 0x107   :  { %v550_v23 = vadd.f32 %v736_v21, %v501_v20  ;;  %v553_v29 = vmax.f32 %v539_v22, 0.0 }
 0x108   :  { %v541_v25 = vpop.f32.mrf.mxu0 }
 0x109   :  { %v556_v27 = vmax.f32 %v550_v23, 0.0  ;;  %v542_v28 = vadd.f32 %v541_v25, %v493_v24 }
 0x10b   :  { %v648_v30 = vpack.c.bf16 %v556_v27, %v555_v26  ;;  %v554_v31 = vmax.f32 %v542_v28, 0.0 }
 0x10d   :  { %650 = vst [vmem:[%s973_s3 + $0x8] sm:$0xff] %v648_v30   ;;  %v643_v32 = vpack.c.bf16 %v554_v31, %v553_v29 }
 0x10f   :  { %644 = vst [vmem:[%s973_s3] sm:$0xff] %v643_v32  }

</bundles_post_ra>
